<compile_context>
chip_gen: v7x
topology: tpu7x:2x2x1
jax: 0.10.0
libtpu: 0.0.40
codegen_flags: <defaults>
</compile_context>

<pallas_src>
import functools

import jax
import jax.numpy as jnp
from jax.experimental import pallas as pl
from jax.experimental.pallas import tpu as pltpu


def _round_up(n, m):
    return ((n + m - 1) // m) * m


def _pick_k_tile(in_pad):
    # in_pad is always a multiple of 128, so 128 always divides.
    for tk in (512, 256, 128):
        if in_pad % tk == 0:
            return tk
    return in_pad


# ----------------------------------------------------------------------------
# In-kernel helper: y = softmax_j(p_i * t_j) @ g, streamed over j.
# f = p ⊗ t is rank-1, so the row max is analytic and exact:
#     m_i = p_i * max_j t_j   if p_i >= 0   else   p_i * min_j t_j
# ----------------------------------------------------------------------------
def _rank1_attention(g, t, p, chunk):
    H = t.shape[-1]
    tmax = jnp.max(t, axis=-1, keepdims=True)                 # (Bt, 1)
    tmin = jnp.min(t, axis=-1, keepdims=True)                 # (Bt, 1)
    m = jnp.where(p >= 0.0, p * tmax, p * tmin)               # (Bt, H) exact row max
    num = jnp.zeros_like(p)
    den = jnp.zeros_like(p)
    for j0 in range(0, H, chunk):                             # static chunk loop
        t_c = t[:, j0:j0 + chunk]                             # (Bt, c)
        g_c = g[:, j0:j0 + chunk]
        e = jnp.exp(p[:, :, None] * t_c[:, None, :] - m[:, :, None])   # (Bt, H, c)
        num = num + jnp.sum(e * g_c[:, None, :], axis=-1)
        den = den + jnp.sum(e, axis=-1)
    return num * pl.reciprocal(den, approx=True)              # (Bt, H)


# ----------------------------------------------------------------------------
# Eval kernel (mode='test' or droprate==0): head folded through the residual.
# Grid = (batch tiles, K tiles); K is a reduction axis ("arbitrary").
# ----------------------------------------------------------------------------
def _atloc_eval_kernel(flat_ref,            # (Bt, tk)  bf16
                       wfe_ref,             # (tk, C)   bf16
                       bfe_ref,             # (1, C)    f32
                       wgtp_ref, bgtp_ref,  # (C, NP) bf16, (1, NP) f32   [g|theta|phi|0]
                       whead_ref,           # (C, 128) bf16   Wh in lanes 0..5
                       bheadf_ref,          # (1, 128) f32    bw@Wh + bh in lanes 0..5
                       wyhead_ref,          # (H, 128) bf16   Ww@Wh in lanes 0..5
                       out_ref,             # (Bt, 128) f32
                       feat_acc,            # VMEM (Bt, C) f32
                       *, H, chunk):
    k = pl.program_id(1)

    @pl.when(k == 0)
    def _():
        feat_acc[...] = jnp.zeros_like(feat_acc)

    feat_acc[...] += jnp.dot(flat_ref[...], wfe_ref[...],
                             preferred_element_type=jnp.float32)

    @pl.when(k == pl.num_programs(1) - 1)
    def _():
        x = jnp.tanh(feat_acc[...] + bfe_ref[...])            # (Bt, C) f32
        xb = x.astype(jnp.bfloat16)

        # fused g|theta|phi projection (lane-dense, padded to a multiple of 128)
        proj = jnp.dot(xb, wgtp_ref[...],
                       preferred_element_type=jnp.float32) + bgtp_ref[...]
        g = proj[:, 0 * H:1 * H]
        t = proj[:, 1 * H:2 * H]
        p = proj[:, 2 * H:3 * H]

        y = _rank1_attention(g, t, p, chunk)                  # (Bt, H)

        # folded head: out = x@Wh + y@(Ww@Wh) + (bw@Wh + bh)
        out = (jnp.dot(xb, whead_ref[...], preferred_element_type=jnp.float32)
               + bheadf_ref[...]
               + jnp.dot(y.astype(jnp.bfloat16), wyhead_ref[...],
                         preferred_element_type=jnp.float32))
        out_ref[...] = out.astype(out_ref.dtype)


# ----------------------------------------------------------------------------
# Train kernel: dropout sits between the residual and the head, so keep the
# explicit W / residual / head path.  The keep*scale mask comes in as an input.
# ----------------------------------------------------------------------------
def _atloc_train_kernel(flat_ref,            # (Bt, tk)  bf16
                        wfe_ref,             # (tk, C)   bf16
                        bfe_ref,             # (1, C)    f32
                        wgtp_ref, bgtp_ref,  # (C, NP) bf16, (1, NP) f32
                        ww_ref, bw_ref,      # (H, C) bf16, (1, C) f32
                        mask_ref,            # (Bt, C) f32  dropout keep * 1/(1-p)
                        whead_ref, bhead_ref,  # (C, 128) bf16, (1, 128) f32
                        out_ref,             # (Bt, 128) f32
                        feat_acc,            # VMEM (Bt, C) f32
                        *, H, chunk):
    k = pl.program_id(1)

    @pl.when(k == 0)
    def _():
        feat_acc[...] = jnp.zeros_like(feat_acc)

    feat_acc[...] += jnp.dot(flat_ref[...], wfe_ref[...],
                             preferred_element_type=jnp.float32)

    @pl.when(k == pl.num_programs(1) - 1)
    def _():
        x = jnp.tanh(feat_acc[...] + bfe_ref[...])            # (Bt, C)
        xb = x.astype(jnp.bfloat16)

        proj = jnp.dot(xb, wgtp_ref[...],
                       preferred_element_type=jnp.float32) + bgtp_ref[...]
        g = proj[:, 0 * H:1 * H]
        t = proj[:, 1 * H:2 * H]
        p = proj[:, 2 * H:3 * H]

        y = _rank1_attention(g, t, p, chunk)                  # (Bt, H)

        wy = jnp.dot(y.astype(jnp.bfloat16), ww_ref[...],
                     preferred_element_type=jnp.float32) + bw_ref[...]
        z = (wy + x) * mask_ref[...]                          # F.dropout(z, p)

        out = jnp.dot(z.astype(jnp.bfloat16), whead_ref[...],
                      preferred_element_type=jnp.float32) + bhead_ref[...]
        out_ref[...] = out.astype(out_ref.dtype)


# ----------------------------------------------------------------------------
# One-time parameter packing (hoisted out of the per-call forward path).
# ----------------------------------------------------------------------------
def pack_atloc_params(params):
    In, C = params["w_fe"].shape
    H = C // 8
    NP = _round_up(3 * H, 128)       # fused g|theta|phi lane width
    NH = 128                         # head slab lane width (real columns: 0..5)
    In_pad = _round_up(In, 128)

    wfe = params["w_fe"].astype(jnp.bfloat16)
    if In_pad != In:                 # zero K-padding: no contribution to the matmul
        wfe = jnp.pad(wfe, ((0, In_pad - In), (0, 0)))
    bfe = params["b_fe"].reshape(1, C).astype(jnp.float32)

    # fused g | theta | phi projection
    w_gtp = jnp.zeros((C, NP), jnp.float32)
    w_gtp = w_gtp.at[:, 0 * H:1 * H].set(params["wg"])
    w_gtp = w_gtp.at[:, 1 * H:2 * H].set(params["wt"])
    w_gtp = w_gtp.at[:, 2 * H:3 * H].set(params["wp"])
    b_gtp = jnp.zeros((1, NP), jnp.float32)
    b_gtp = b_gtp.at[0, 0 * H:1 * H].set(params["bg"])
    b_gtp = b_gtp.at[0, 1 * H:2 * H].set(params["bt"])
    b_gtp = b_gtp.at[0, 2 * H:3 * H].set(params["bp"])

    # pose head (fc_xyz1 | fc_wpqr1) in lanes 0..5 of a 128-wide slab
    w_head = jnp.zeros((C, NH), jnp.float32).at[:, :6].set(params["whead"])
    b_head = jnp.zeros((1, NH), jnp.float32).at[0, :6].set(params["bhead"])

    # eval-path fold of the head through the residual
    b_fold = params["bw"].reshape(1, C) @ params["whead"] + params["bhead"].reshape(1, 6)
    b_head_fold = jnp.zeros((1, NH), jnp.float32).at[0, :6].set(b_fold[0])
    w_yhead = jnp.zeros((H, NH), jnp.float32).at[:, :6].set(params["ww"] @ params["whead"])

    return dict(
        In=In, In_pad=In_pad, C=C, H=H, NP=NP, NH=NH,
        wfe=wfe, bfe=bfe,
        w_gtp=w_gtp.astype(jnp.bfloat16), b_gtp=b_gtp,
        w_head=w_head.astype(jnp.bfloat16), b_head=b_head,
        b_head_fold=b_head_fold,
        w_yhead=w_yhead.astype(jnp.bfloat16),
        ww=params["ww"].astype(jnp.bfloat16),
        bw=params["bw"].reshape(1, C).astype(jnp.float32),
    )


# ----------------------------------------------------------------------------
# Forward wrapper: pads the activations, builds the grid and launches the kernel.
# ----------------------------------------------------------------------------
def atloc_forward_pallas(image, depth, packed, *, train=False, droprate=0.5, rng=None):
    B = image.shape[0]
    C, H, NP, NH = packed["C"], packed["H"], packed["NP"], packed["NH"]
    In, In_pad = packed["In"], packed["In_pad"]

    # bf16 activations: half the HBM->VMEM DMA and half the VMEM block.
    flat = jnp.concatenate([image.reshape(B, -1), depth.reshape(B, -1)],
                           axis=1).astype(jnp.bfloat16)
    assert flat.shape[1] == In, (flat.shape, In)

    # batch tile: at least 2 grid steps when B allows (v7x 2-TC sharding / pipelining)
    b_tile = min(128, _round_up(max(1, (B + 1) // 2), 8))
    B_pad = _round_up(B, b_tile)
    tk = _pick_k_tile(In_pad)

    pad_b, pad_k = B_pad - B, In_pad - In
    if pad_b or pad_k:
        flat = jnp.pad(flat, ((0, pad_b), (0, pad_k)))

    grid = (B_pad // b_tile, In_pad // tk)
    chunk = min(H, 128)                                   # attention j-chunk width

    # NOTE: on v5e (16 MiB scoped-VMEM default) / v7x (64 MiB physical) set
    # pltpu.CompilerParams(vmem_limit_bytes=...) from the actual resident blocks
    # when scaling b_tile / feat_dim up; defaults are fine at these sizes.
    cparams = pltpu.CompilerParams(dimension_semantics=("parallel", "arbitrary"))

    row_k = lambda i, k: (i, k)      # flat: batch tile x K tile
    row0 = lambda i, k: (i, 0)       # per-batch-tile block, resident across K
    kslice = lambda i, k: (k, 0)     # wfe K slice
    const = lambda i, k: (0, 0)      # resident weights / biases

    if (not train) or droprate <= 0.0:
        kernel = functools.partial(_atloc_eval_kernel, H=H, chunk=chunk)
        flops = 2 * B_pad * (In_pad * C + C * NP + C * NH + H * NH) + 3 * B_pad * H * H
        transc = B_pad * (C + H * H)
        bytes_acc = (B_pad * In_pad * 2 + In_pad * C * 2 + C * 4 + C * NP * 2 + NP * 4
                     + C * NH * 2 + NH * 4 + H * NH * 2 + B_pad * NH * 4)
        out = pl.pallas_call(
            kernel,
            out_shape=jax.ShapeDtypeStruct((B_pad, NH), jnp.float32),
            grid_spec=pltpu.PrefetchScalarGridSpec(
                num_scalar_prefetch=0,
                grid=grid,
                in_specs=[pl.BlockSpec((b_tile, tk), row_k),
                          pl.BlockSpec((tk, C), kslice),
                          pl.BlockSpec((1, C), const),
                          pl.BlockSpec((C, NP), const),
                          pl.BlockSpec((1, NP), const),
                          pl.BlockSpec((C, NH), const),
                          pl.BlockSpec((1, NH), const),
                          pl.BlockSpec((H, NH), const)],
                out_specs=pl.BlockSpec((b_tile, NH), row0),
                scratch_shapes=[pltpu.VMEM((b_tile, C), jnp.float32)]),
            compiler_params=cparams,
            cost_estimate=pl.CostEstimate(flops=flops, transcendentals=transc,
                                          bytes_accessed=bytes_acc),
        )(flat, packed["wfe"], packed["bfe"],
          packed["w_gtp"], packed["b_gtp"],
          packed["w_head"], packed["b_head_fold"], packed["w_yhead"])
        return out[:B, :6]

    # ---- train path: dropout active ----
    if not (0.0 < droprate < 1.0):
        raise ValueError(f"train-path droprate must be in (0, 1), got {droprate}")
    if rng is None:
        rng = jax.random.PRNGKey(0)
    # F.dropout semantics: zero with prob p, scale kept by 1/(1-p).
    # (Stochastic: not bit-exact to torch's RNG.)
    keep = jax.random.bernoulli(rng, 1.0 - droprate, (B_pad, C))
    mask = keep.astype(jnp.float32) * (1.0 / (1.0 - droprate))

    kernel = functools.partial(_atloc_train_kernel, H=H, chunk=chunk)
    flops = (2 * B_pad * (In_pad * C + C * NP + H * C + C * NH)
             + 3 * B_pad * H * H)
    transc = B_pad * (C + H * H)
    bytes_acc = (B_pad * In_pad * 2 + In_pad * C * 2 + C * 4 + C * NP * 2 + NP * 4
                 + H * C * 2 + C * 4 + B_pad * C * 4 + C * NH * 2 + NH * 4
                 + B_pad * NH * 4)
    out = pl.pallas_call(
        kernel,
        out_shape=jax.ShapeDtypeStruct((B_pad, NH), jnp.float32),
        grid_spec=pltpu.PrefetchScalarGridSpec(
            num_scalar_prefetch=0,
            grid=grid,
            in_specs=[pl.BlockSpec((b_tile, tk), row_k),
                      pl.BlockSpec((tk, C), kslice),
                      pl.BlockSpec((1, C), const),
                      pl.BlockSpec((C, NP), const),
                      pl.BlockSpec((1, NP), const),
                      pl.BlockSpec((H, C), const),
                      pl.BlockSpec((1, C), const),
                      pl.BlockSpec((b_tile, C), row0),
                      pl.BlockSpec((C, NH), const),
                      pl.BlockSpec((1, NH), const)],
            out_specs=pl.BlockSpec((b_tile, NH), row0),
            scratch_shapes=[pltpu.VMEM((b_tile, C), jnp.float32)]),
        compiler_params=cparams,
        cost_estimate=pl.CostEstimate(flops=flops, transcendentals=transc,
                                      bytes_accessed=bytes_acc),
    )(flat, packed["wfe"], packed["bfe"],
      packed["w_gtp"], packed["b_gtp"],
      packed["ww"], packed["bw"], mask,
      packed["w_head"], packed["b_head"])
    return out[:B, :6]


# ----------------------------------------------------------------------------
# Plain-JAX f32 reference (for correctness check)
# ----------------------------------------------------------------------------
def atloc_forward_ref(image, depth, params):
    B = image.shape[0]
    flat = jnp.concatenate([image.reshape(B, -1), depth.reshape(B, -1)], axis=1)
    feature = flat @ params["w_fe"] + params["b_fe"]
    x = jnp.tanh(feature)
    g = x @ params["wg"] + params["bg"]
    t = x @ params["wt"] + params["bt"]
    p = x @ params["wp"] + params["bp"]
    f = p[:, :, None] * t[:, None, :]
    attn = jax.nn.softmax(f, axis=-1)
    y = jnp.einsum("bij,bj->bi", attn, g)
    z = y @ params["ww"] + params["bw"] + x
    return z @ params["whead"] + params["bhead"]


# ----------------------------------------------------------------------------
# Deterministic synthetic parameters (weights stored pre-transposed: (in, out)).
# Pose heads: kaiming_normal_ weights + zero bias (as in the module's init);
# AttentionBlock / feature-extractor glue linears: kaiming weights + small biases.
# ----------------------------------------------------------------------------
def make_params(key, feat_dim, in_flat):
    # TODO(synk): the external `feature_extractor(image, depth)` is not defined in the
    # module; it is modeled here as a single fused linear on the flattened image|depth.
    H = feat_dim // 8
    ks = jax.random.split(key, 12)

    def kaiming(k, fan_in, shape):
        return jax.random.normal(k, shape, jnp.float32) * jnp.sqrt(2.0 / fan_in)

    def unif_bias(k, fan_in, n):
        bound = 1.0 / float(fan_in) ** 0.5
        return jax.random.uniform(k, (n,), jnp.float32, -bound, bound)

    w_fe = kaiming(ks[0], in_flat, (in_flat, feat_dim))
    b_fe = jnp.zeros((feat_dim,), jnp.float32)
    wg = kaiming(ks[1], feat_dim, (feat_dim, H)); bg = unif_bias(ks[2], feat_dim, H)
    wt = kaiming(ks[3], feat_dim, (feat_dim, H)); bt = unif_bias(ks[4], feat_dim, H)
    wp = kaiming(ks[5], feat_dim, (feat_dim, H)); bp = unif_bias(ks[6], feat_dim, H)
    ww = kaiming(ks[7], H, (H, feat_dim));        bw = unif_bias(ks[8], H, feat_dim)
    wxyz = kaiming(ks[9], feat_dim, (feat_dim, 3))
    wwpqr = kaiming(ks[10], feat_dim, (feat_dim, 3))
    whead = jnp.concatenate([wxyz, wwpqr], axis=1)     # fused [fc_xyz1 | fc_wpqr1]
    bhead = jnp.zeros((6,), jnp.float32)
    return dict(w_fe=w_fe, b_fe=b_fe, wg=wg, bg=bg, wt=wt, bt=bt, wp=wp, bp=bp,
                ww=ww, bw=bw, whead=whead, bhead=bhead)


if __name__ == "__main__":
    key = jax.random.PRNGKey(0)
    k_img, k_dep, k_par, k_drop = jax.random.split(key, 4)

    B, Cin, Hs, Ws = 2, 4, 16, 16
    feat_dim = 256                      # opt.dim; feat_dim // 8 = 32

    image = jax.random.normal(k_img, (B, Cin, Hs, Ws), jnp.float32)   # NCHW
    depth = jax.random.normal(k_dep, (B, Cin, Hs, Ws), jnp.float32)   # NCHW
    params = make_params(k_par, feat_dim, in_flat=2 * Cin * Hs * Ws)

    packed = pack_atloc_params(params)   # one-time packing (hoisted out of forward)

    # mode='test' path (no dropout): deterministic check against the f32 reference.
    out = atloc_forward_pallas(image, depth, packed, train=False, droprate=0.5)
    out = jax.block_until_ready(out)
    ref = atloc_forward_ref(image, depth, params)
    assert out.shape == (B, 6), out.shape
    # bf16 MXU operands + approx EUP reciprocal: tolerance loosened vs f32 reference.
    assert jnp.allclose(out, ref, rtol=1e-1, atol=1e-1), (out, ref)

    # mode='train' path (stochastic dropout): exercise the kernel, sanity-check only.
    out_tr = atloc_forward_pallas(image, depth, packed, train=True, droprate=0.5,
                                  rng=k_drop)
    out_tr = jax.block_until_ready(out_tr)
    assert out_tr.shape == (B, 6), out_tr.shape
    assert bool(jnp.all(jnp.isfinite(out_tr)))

    # TODO(synk): 'vmloc' branch (KL terms from the external feature extractor's
    # pz/qz_x distributions) has no in-module definition and is not implemented.
    print("KERNEL_OK")
</pallas_src>

<mosaic_0001>
module attributes {stable_mosaic.version = 11 : i64} {
  func.func @_atloc_eval_kernel(%arg0: i32, %arg1: i32, %arg2: memref<8x512xbf16, #tpu.memory_space<vmem>>, %arg3: memref<512x256xbf16, #tpu.memory_space<vmem>>, %arg4: memref<1x256xf32, #tpu.memory_space<vmem>>, %arg5: memref<256x128xbf16, #tpu.memory_space<vmem>>, %arg6: memref<1x128xf32, #tpu.memory_space<vmem>>, %arg7: memref<256x128xbf16, #tpu.memory_space<vmem>>, %arg8: memref<1x128xf32, #tpu.memory_space<vmem>>, %arg9: memref<32x128xbf16, #tpu.memory_space<vmem>>, %arg10: memref<8x128xf32, #tpu.memory_space<vmem>>, %arg11: memref<8x256xf32, #tpu.memory_space<vmem>>) attributes {dimension_semantics = [#tpu.dimension_semantics<parallel>, #tpu.dimension_semantics<arbitrary>], iteration_bounds = array<i64: 1, 4>, scalar_prefetch = 0 : i64, scratch_operands = 1 : i64, tpu.core_type = #tpu.core_type<tc>, window_params = [{transform_indices = @transform_0, window_bounds = array<i64: 8, 512>}, {transform_indices = @transform_1, window_bounds = array<i64: 512, 256>}, {pipeline_mode = #tpu.pipeline_mode<synchronous>, transform_indices = @transform_2, window_bounds = array<i64: 1, 256>}, {pipeline_mode = #tpu.pipeline_mode<synchronous>, transform_indices = @transform_3, window_bounds = array<i64: 256, 128>}, {pipeline_mode = #tpu.pipeline_mode<synchronous>, transform_indices = @transform_4, window_bounds = array<i64: 1, 128>}, {pipeline_mode = #tpu.pipeline_mode<synchronous>, transform_indices = @transform_5, window_bounds = array<i64: 256, 128>}, {pipeline_mode = #tpu.pipeline_mode<synchronous>, transform_indices = @transform_6, window_bounds = array<i64: 1, 128>}, {pipeline_mode = #tpu.pipeline_mode<synchronous>, transform_indices = @transform_7, window_bounds = array<i64: 32, 128>}, {transform_indices = @transform_8, window_bounds = array<i64: 8, 128>}]} {
    %c0_i32 = arith.constant 0 : i32
    %0 = arith.cmpi eq, %arg1, %c0_i32 : i32
    %1 = arith.extui %0 : i1 to i32
    %c0_i32_0 = arith.constant 0 : i32
    %2 = arith.cmpi ne, %1, %c0_i32_0 : i32
    scf.if %2 {
      %cst_9 = arith.constant 0.000000e+00 : f32
      %12 = vector.broadcast %cst_9 : f32 to vector<8x256xf32>
      %c0_10 = arith.constant 0 : index
      %c0_11 = arith.constant 0 : index
      %13 = vector.load %arg11[%c0_10, %c0_11] : memref<8x256xf32, #tpu.memory_space<vmem>>, vector<8x256xf32>
      tpu.vector_store %arg11[%c0_10, %c0_11], %12 {strides = array<i32>} : memref<8x256xf32, #tpu.memory_space<vmem>>, vector<8x256xf32>,
    } else {
    }
    %c0 = arith.constant 0 : index
    %c0_1 = arith.constant 0 : index
    %3 = vector.load %arg11[%c0, %c0_1] : memref<8x256xf32, #tpu.memory_space<vmem>>, vector<8x256xf32>
    %c0_2 = arith.constant 0 : index
    %c0_3 = arith.constant 0 : index
    %4 = vector.load %arg2[%c0_2, %c0_3] : memref<8x512xbf16, #tpu.memory_space<vmem>>, vector<8x512xbf16>
    %c0_4 = arith.constant 0 : index
    %c0_5 = arith.constant 0 : index
    %5 = vector.load %arg3[%c0_4, %c0_5] : memref<512x256xbf16, #tpu.memory_space<vmem>>, vector<512x256xbf16>
    %cst = arith.constant dense<0.000000e+00> : vector<8x256xf32>
    %6 = tpu.matmul %4, %5, %cst {dimension_numbers = #tpu.dot_dimension_numbers<[1], [0], [0], [1], [0, 0, 1, 1], [], []>} : vector<8x512xbf16>, vector<512x256xbf16>, vector<8x256xf32> -> vector<8x256xf32>
    %7 = arith.addf %3, %6 : vector<8x256xf32>
    %c0_6 = arith.constant 0 : index
    %c0_7 = arith.constant 0 : index
    %8 = vector.load %arg11[%c0_6, %c0_7] : memref<8x256xf32, #tpu.memory_space<vmem>>, vector<8x256xf32>
    tpu.vector_store %arg11[%c0_6, %c0_7], %7 {strides = array<i32>} : memref<8x256xf32, #tpu.memory_space<vmem>>, vector<8x256xf32>,
    %c3_i32 = arith.constant 3 : i32
    %9 = arith.cmpi eq, %arg1, %c3_i32 : i32
    %10 = arith.extui %9 : i1 to i32
    %c0_i32_8 = arith.constant 0 : i32
    %11 = arith.cmpi ne, %10, %c0_i32_8 : i32
    scf.if %11 {
      %c0_9 = arith.constant 0 : index
      %c0_10 = arith.constant 0 : index
      %12 = vector.load %arg11[%c0_9, %c0_10] : memref<8x256xf32, #tpu.memory_space<vmem>>, vector<8x256xf32>
      %c0_11 = arith.constant 0 : index
      %c0_12 = arith.constant 0 : index
      %13 = vector.load %arg4[%c0_11, %c0_12] : memref<1x256xf32, #tpu.memory_space<vmem>>, vector<1x256xf32>
      %14 = vector.broadcast %13 : vector<1x256xf32> to vector<8x256xf32>
      %15 = arith.addf %12, %14 : vector<8x256xf32>
      %16 = math.tanh %15 : vector<8x256xf32>
      %17 = arith.truncf %16 : vector<8x256xf32> to vector<8x256xbf16>
      %c0_13 = arith.constant 0 : index
      %c0_14 = arith.constant 0 : index
      %18 = vector.load %arg5[%c0_13, %c0_14] : memref<256x128xbf16, #tpu.memory_space<vmem>>, vector<256x128xbf16>
      %cst_15 = arith.constant dense<0.000000e+00> : vector<8x128xf32>
      %19 = tpu.matmul %17, %18, %cst_15 {dimension_numbers = #tpu.dot_dimension_numbers<[1], [0], [0], [1], [0, 0, 1, 1], [], []>} : vector<8x256xbf16>, vector<256x128xbf16>, vector<8x128xf32> -> vector<8x128xf32>
      %c0_16 = arith.constant 0 : index
      %c0_17 = arith.constant 0 : index
      %20 = vector.load %arg6[%c0_16, %c0_17] : memref<1x128xf32, #tpu.memory_space<vmem>>, vector<1x128xf32>
      %21 = vector.broadcast %20 : vector<1x128xf32> to vector<8x128xf32>
      %22 = arith.addf %19, %21 : vector<8x128xf32>
      %23 = vector.extract_strided_slice %22 {offsets = [0, 0], sizes = [8, 32], strides = [1, 1]} : vector<8x128xf32> to vector<8x32xf32>
      %24 = vector.extract_strided_slice %22 {offsets = [0, 32], sizes = [8, 32], strides = [1, 1]} : vector<8x128xf32> to vector<8x32xf32>
      %25 = vector.extract_strided_slice %22 {offsets = [0, 64], sizes = [8, 32], strides = [1, 1]} : vector<8x128xf32> to vector<8x32xf32>
      %cst_18 = arith.constant dense<0xFF800000> : vector<8xf32>
      %26 = vector.multi_reduction <maximumf>, %24, %cst_18 [1] : vector<8x32xf32> to vector<8xf32>
      %27 = vector.shape_cast %26 : vector<8xf32> to vector<8x1xf32>
      %cst_19 = arith.constant dense<0x7F800000> : vector<8xf32>
      %28 = vector.multi_reduction <minimumf>, %24, %cst_19 [1] : vector<8x32xf32> to vector<8xf32>
      %29 = vector.shape_cast %28 : vector<8xf32> to vector<8x1xf32>
      %cst_20 = arith.constant 0.000000e+00 : f32
      %30 = vector.broadcast %cst_20 : f32 to vector<8x32xf32>
      %31 = arith.cmpf oge, %25, %30 : vector<8x32xf32>
      %32 = vector.broadcast %27 : vector<8x1xf32> to vector<8x32xf32>
      %33 = arith.mulf %25, %32 : vector<8x32xf32>
      %34 = vector.broadcast %29 : vector<8x1xf32> to vector<8x32xf32>
      %35 = arith.mulf %25, %34 : vector<8x32xf32>
      %36 = arith.select %31, %33, %35 : vector<8x32xi1>, vector<8x32xf32>
      %cst_21 = arith.constant 0.000000e+00 : f32
      %37 = vector.broadcast %cst_21 : f32 to vector<8x32xf32>
      %cst_22 = arith.constant 0.000000e+00 : f32
      %38 = vector.broadcast %cst_22 : f32 to vector<8x32xf32>
      %39 = vector.shape_cast %25 : vector<8x32xf32> to vector<8x32x1xf32>
      %40 = vector.shape_cast %24 : vector<8x32xf32> to vector<8x1x32xf32>
      %41 = vector.broadcast %39 : vector<8x32x1xf32> to vector<8x32x32xf32>
      %42 = vector.broadcast %40 : vector<8x1x32xf32> to vector<8x32x32xf32>
      %43 = arith.mulf %41, %42 : vector<8x32x32xf32>
      %44 = vector.shape_cast %36 : vector<8x32xf32> to vector<8x32x1xf32>
      %45 = vector.broadcast %44 : vector<8x32x1xf32> to vector<8x32x32xf32>
      %46 = arith.subf %43, %45 : vector<8x32x32xf32>
      %47 = math.exp %46 : vector<8x32x32xf32>
      %48 = vector.shape_cast %23 : vector<8x32xf32> to vector<8x1x32xf32>
      %49 = vector.broadcast %48 : vector<8x1x32xf32> to vector<8x32x32xf32>
      %50 = arith.mulf %47, %49 : vector<8x32x32xf32>
      %cst_23 = arith.constant dense<0.000000e+00> : vector<8x32xf32>
      %51 = vector.multi_reduction <add>, %50, %cst_23 [2] : vector<8x32x32xf32> to vector<8x32xf32>
      %52 = arith.addf %37, %51 : vector<8x32xf32>
      %cst_24 = arith.constant dense<0.000000e+00> : vector<8x32xf32>
      %53 = vector.multi_reduction <add>, %47, %cst_24 [2] : vector<8x32x32xf32> to vector<8x32xf32>
      %54 = arith.addf %38, %53 : vector<8x32xf32>
      %55 = tpu.reciprocal %54 {approx = true} : vector<8x32xf32> -> vector<8x32xf32>
      %56 = arith.mulf %52, %55 : vector<8x32xf32>
      %c0_25 = arith.constant 0 : index
      %c0_26 = arith.constant 0 : index
      %57 = vector.load %arg7[%c0_25, %c0_26] : memref<256x128xbf16, #tpu.memory_space<vmem>>, vector<256x128xbf16>
      %cst_27 = arith.constant dense<0.000000e+00> : vector<8x128xf32>
      %58 = tpu.matmul %17, %57, %cst_27 {dimension_numbers = #tpu.dot_dimension_numbers<[1], [0], [0], [1], [0, 0, 1, 1], [], []>} : vector<8x256xbf16>, vector<256x128xbf16>, vector<8x128xf32> -> vector<8x128xf32>
      %c0_28 = arith.constant 0 : index
      %c0_29 = arith.constant 0 : index
      %59 = vector.load %arg8[%c0_28, %c0_29] : memref<1x128xf32, #tpu.memory_space<vmem>>, vector<1x128xf32>
      %60 = vector.broadcast %59 : vector<1x128xf32> to vector<8x128xf32>
      %61 = arith.addf %58, %60 : vector<8x128xf32>
      %62 = arith.truncf %56 : vector<8x32xf32> to vector<8x32xbf16>
      %c0_30 = arith.constant 0 : index
      %c0_31 = arith.constant 0 : index
      %63 = vector.load %arg9[%c0_30, %c0_31] : memref<32x128xbf16, #tpu.memory_space<vmem>>, vector<32x128xbf16>
      %cst_32 = arith.constant dense<0.000000e+00> : vector<8x128xf32>
      %64 = tpu.matmul %62, %63, %cst_32 {dimension_numbers = #tpu.dot_dimension_numbers<[1], [0], [0], [1], [0, 0, 1, 1], [], []>} : vector<8x32xbf16>, vector<32x128xbf16>, vector<8x128xf32> -> vector<8x128xf32>
      %65 = arith.addf %61, %64 : vector<8x128xf32>
      %c0_33 = arith.constant 0 : index
      %c0_34 = arith.constant 0 : index
      %66 = vector.load %arg10[%c0_33, %c0_34] : memref<8x128xf32, #tpu.memory_space<vmem>>, vector<8x128xf32>
      tpu.vector_store %arg10[%c0_33, %c0_34], %65 {strides = array<i32>} : memref<8x128xf32, #tpu.memory_space<vmem>>, vector<8x128xf32>,
    } else {
    }
    return
  }
  func.func @transform_0(%arg0: i32, %arg1: i32) -> (i32, i32) {
    %c0_i32 = arith.constant 0 : i32
    return %arg0, %arg1 : i32, i32
  }
  func.func @transform_1(%arg0: i32, %arg1: i32) -> (i32, i32) {
    %c0_i32 = arith.constant 0 : i32
    %c0_i32_0 = arith.constant 0 : i32
    return %arg1, %c0_i32 : i32, i32
  }
  func.func @transform_2(%arg0: i32, %arg1: i32) -> (i32, i32) {
    %c0_i32 = arith.constant 0 : i32
    %c0_i32_0 = arith.constant 0 : i32
    %c0_i32_1 = arith.constant 0 : i32
    return %c0_i32, %c0_i32_0 : i32, i32
  }
  func.func @transform_3(%arg0: i32, %arg1: i32) -> (i32, i32) {
    %c0_i32 = arith.constant 0 : i32
    %c0_i32_0 = arith.constant 0 : i32
    %c0_i32_1 = arith.constant 0 : i32
    return %c0_i32, %c0_i32_0 : i32, i32
  }
  func.func @transform_4(%arg0: i32, %arg1: i32) -> (i32, i32) {
    %c0_i32 = arith.constant 0 : i32
    %c0_i32_0 = arith.constant 0 : i32
    %c0_i32_1 = arith.constant 0 : i32
    return %c0_i32, %c0_i32_0 : i32, i32
  }
  func.func @transform_5(%arg0: i32, %arg1: i32) -> (i32, i32) {
    %c0_i32 = arith.constant 0 : i32
    %c0_i32_0 = arith.constant 0 : i32
    %c0_i32_1 = arith.constant 0 : i32
    return %c0_i32, %c0_i32_0 : i32, i32
  }
  func.func @transform_6(%arg0: i32, %arg1: i32) -> (i32, i32) {
    %c0_i32 = arith.constant 0 : i32
    %c0_i32_0 = arith.constant 0 : i32
    %c0_i32_1 = arith.constant 0 : i32
    return %c0_i32, %c0_i32_0 : i32, i32
  }
  func.func @transform_7(%arg0: i32, %arg1: i32) -> (i32, i32) {
    %c0_i32 = arith.constant 0 : i32
    %c0_i32_0 = arith.constant 0 : i32
    %c0_i32_1 = arith.constant 0 : i32
    return %c0_i32, %c0_i32_0 : i32, i32
  }
  func.func @transform_8(%arg0: i32, %arg1: i32) -> (i32, i32) {
    %c0_i32 = arith.constant 0 : i32
    %c0_i32_0 = arith.constant 0 : i32
    return %arg0, %c0_i32 : i32, i32
  }
}

</mosaic_0001>

<bundles_post_ra>
// kernel: tpu_custom_call.1
= control target key start
LH: loop header
LB: loop body
LE: loop exit
PB: predicated region body
PF: predicated region fallthrough
CT: control target
= control target key end

     0   :  { %s4699_s0 = inlined_call_operand.hbm [shape: bf16[8,2048], index: 0, kind: input, shape index: {}]   ;;  %s4700_s1 = inlined_call_operand.hbm [shape: bf16[2048,256], index: 1, kind: input, shape index: {}]   ;;  %s4701_s2 = inlined_call_operand.vmem [shape: f32[1,256], index: 2, kind: input, shape index: {}]   ;;  %s4702_s3 = inlined_call_operand.hbm [shape: bf16[256,128], index: 3, kind: input, shape index: {}]   ;;  %s4703_s4 = inlined_call_operand.vmem [shape: f32[1,128], index: 4, kind: input, shape index: {}]   ;;  %s4704_s5 = inlined_call_operand.hbm [shape: bf16[256,128], index: 5, kind: input, shape index: {}]   ;;  %s4705_s6 = inlined_call_operand.vmem [shape: f32[1,128], index: 6, kind: input, shape index: {}]   ;;  %s4706_s7 = inlined_call_operand.vmem [shape: bf16[32,128], index: 7, kind: input, shape index: {}]   ;;  %s4707_s8 = inlined_call_operand.hbm [shape: f32[8,128], index: 8, kind: output, shape index: {}]  }
   0x1   :  { %4711 = sst [smem:[#allocation17_spill]] %s4699_s0 }
   0x2   :  { %4712 = sst [smem:[#allocation18_spill]] %s4702_s3 }
   0x3   :  { %4713 = sst [smem:[#allocation19_spill]] %s4704_s5 }
   0x4   :  { %13 = vsyncpa [#allocation4], 0 }
   0x5   :  { %15 = vsyncpa [#allocation4 + $0x1], 0 }
   0x6   :  { %16 = vsyncpa [#allocation7], 0 }
   0x7   :  { %18 = vsyncpa [#allocation7 + $0x1], 0 }
   0x8   :  { %19 = vsyncpa [#allocation10], 0 }
   0x9   :  { %20 = vsyncpa [#allocation5], 0  ;;  %s3689_s27 = smov 0   ;;  %s3691_s28 = smov 0  }
   0xa   :  { %s3693_s29 = smov 0   ;;  %s3695_s30 = smov 0  }
   0xb   :  { %s3697_s9 = smov 0   ;;  %s3699_s10 = smov 0  }
   0xc LB: > { %s3718_s11 = sadd.s32 4294967295, %s3627_s10   ;;  %p60_p0 = scmp.ne.s32.totalorder %s3611_s28, %s3607_s27  ;;  %s3627_s10 = sphi %s3699_s10, %s26_s10   ;;  %s3623_s9 = sphi %s3697_s9, %s4732_s9   ;;  %s3619_s30 = sphi %s3695_s30, %s4731_s30   ;;  %s3615_s29 = sphi %s3693_s29, %s4730_s29   ;;  %s3611_s28 = sphi %s3691_s28, %s4729_s28   ;;  %s3607_s27 = sphi %s3689_s27, %s4728_s27  }
   0xd   : > { %p4708_p1 = scmp.eq.s32.totalorder %s3718_s11, 0  ;;  %p2870_p2 = scmp.ge.s32.totalorder %s3627_s10, 1 }
   0xe   : > { %p249_p3 = scmp.lt.s32.totalorder %s3627_s10, 5  ;;  %s3629_s14 = smov [#allocation8]  }
   0xf   : > { %p3726_p4 = por %p4708_p1, %p60_p0  ;;  %s264_s15 = sshll.u32 %s3629_s14, 4  ;;  %s265_s15 = int_to_ptr.vmem [resolvable:$true] %s264_s15 }
  0x10   : > { %p3730_p5 = pnand %p2870_p2, %p249_p3  ;;  %s3630_s17 = smov [#allocation9]  }
  0x11   : > { %s4714_s12 = scalar_select %p3726_p4, 1, 0 }
  0x12   : > { %s4715_s13 = scalar_select %p3730_p5, 1, 0 }
  0x13   : > { %p3071_p6 = pneg %p3730_p5  ;;  %s280_s18 = sshll.u32 %s3630_s17, 4  ;;  %s3742_s18 = int_to_ptr.vmem [resolvable:$true] %s280_s18 }
  0x14   : > { %s4717_s3 = sld [smem:[#allocation18_spill]] }
  0x15   : > { %p3738_p7 = pnand %p3071_p6, %p4708_p1 }
  0x17   : > { %p3421_p9 = pneg %p3738_p7 }
  0x1a   : > { %s3419_s21 = scalar_lea.hbm %s4717_s3, 2048 }
  0x1b   : > { %p3420_p8 = scmp.ne.s32.totalorder %s4717_s3, %s3419_s21  ;;  %p3426_p12 = scmp.lt.u32.totalorder %s3419_s21, %s4717_s3 }
  0x1d   : > { %p3422_p10 = pnand %p3421_p9, %p3420_p8 }
  0x1f   : > { %p3423_p11 = pneg %p3422_p10 }
  0x21   : > { %p3428_p13 = pnand %p3426_p12, %p3423_p11 }
  0x23   : > { %3431 = shalt.err (!%p3428_p13)
}
  0x24   : > { %s3432_s26 = scalar_lea.vmem %s265_s15, 2048  ;;  %p3440_p6 = scmp.lt.s32.totalorder %s265_s15, %s265_s15 }
  0x25   : > { %p3433_p0 = scmp.ne.s32.totalorder %s265_s15, %s3432_s26  ;;  %p3441_p1 = scmp.lt.s32.totalorder %s3432_s26, %s3432_s26 }
  0x27   : > { %p3435_p2 = pnand %p3433_p0, %p3421_p9  ;;  %p3442_p4 = por %p3441_p1, %p3440_p6 }
  0x29   : > { %p3436_p3 = pneg %p3435_p2 }
  0x2b   : > { %p3443_p5 = pnand %p3442_p4, %p3436_p3 }
  0x2d   : > { %3446 = shalt.err (!%p3443_p5)
}
  0x2e   : > { %s3631_s27 = smov 64   ;;  %s3632_s14 = smov 4  }
  0x2f   : > { %3074 = dma.hbm_to_vmem [thread:$0]  (!%p3738_p7), %s4717_s3, 2048, %s265_s15, [#allocation7], %s3631_s27, %s3631_s27, %s3632_s14  }
  0x30   : > { %s4718_s5 = sld [smem:[#allocation19_spill]] }
  0x36   : > { %s3447_s22 = scalar_lea.hbm %s4718_s5, 2048 }
  0x37   : > { %p3448_p8 = scmp.ne.s32.totalorder %s4718_s5, %s3447_s22  ;;  %p3454_p5 = scmp.lt.u32.totalorder %s3447_s22, %s4718_s5 }
  0x39   : > { %p3450_p1 = pnand %p3448_p8, %p3421_p9 }
  0x3b   : > { %p3451_p4 = pneg %p3450_p1 }
  0x3d   : > { %p3456_p10 = pnand %p3454_p5, %p3451_p4 }
  0x3f   : > { %3459 = shalt.err (!%p3456_p10)
}
  0x40   : > { %s3460_s15 = scalar_lea.vmem %s3742_s18, 2048  ;;  %p3468_p0 = scmp.lt.s32.totalorder %s3742_s18, %s3742_s18 }
  0x41   : > { %p3461_p11 = scmp.ne.s32.totalorder %s3742_s18, %s3460_s15  ;;  %p3469_p2 = scmp.lt.s32.totalorder %s3460_s15, %s3460_s15 }
  0x43   : > { %p3463_p12 = pnand %p3461_p11, %p3421_p9  ;;  %p3470_p3 = por %p3469_p2, %p3468_p0 }
  0x45   : > { %p3464_p13 = pneg %p3463_p12 }
  0x47   : > { %p3471_p6 = pnand %p3470_p3, %p3464_p13 }
  0x49   : > { %3474 = shalt.err (!%p3471_p6)
}
  0x4a   : > { %3077 = dma.hbm_to_vmem [thread:$0]  (!%p3738_p7), %s4718_s5, 2048, %s3742_s18, [#allocation10], %s3631_s27, %s3631_s27, %s3632_s14  }
  0x4b   : > { %s35_s20 = sadd.s32 1, %s3623_s9  ;;  %s47_s21 = sadd.s32 1, %s3615_s29 }
  0x4c   : > { %p36_p9 = scmp.ge.s32.totalorder %s35_s20, 4  ;;  %p54_p8 = scmp.ne.s32.totalorder %s3615_s29, %s3611_s28 }
  0x4d   : > { %p55_p1 = scmp.eq.s32.totalorder %s3627_s10, 0  ;;  %p3087_p4 = scmp.lt.s32.totalorder %s3627_s10, 4 }
  0x4e   : > { %s4734_s20 = smov (%p36_p9, %s35_s20), 0  ;;  %s3800_s16 = sand.u32 1, %s3615_s29  }
  0x4f   : > { %p56_p5 = por %p55_p1, %p54_p8  ;;  %s43_s22 = ssub.s32 %s3623_s9, %s4734_s20 }
  0x50   : > { %p45_p10 = scmp.eq.s32.totalorder %s43_s22, 0  ;;  %s2874_s18 = sshll.u32 %s3800_s16, 4 }
  0x51   : > { %s2997_s27 = sshll.u32 %s3623_s9, 8  ;;  %s4719_s0 = sld [smem:[#allocation17_spill]] }
  0x52   : > { %s3807_s14 = scalar_select %p45_p10, %s3615_s29, %s47_s21  }
  0x53   : > { %s304_s26 = scalar_lea.vmem [#allocation3], %s2874_s18  ;;  %p3818_p7 = pnand %p3087_p4, %p56_p5 }
  0x54   : > { %s314_s15 = sshll.u32 %s304_s26, 4  ;;  %s2877_s19 = sshll.u32 %s3800_s16, 9  ;;  %s3814_s15 = int_to_ptr.vmem [resolvable:$true] %s314_s15 }
  0x55   : > { %s301_s22 = scalar_lea.sflag [#allocation4], %s3800_s16  ;;  %p3477_p12 = pneg %p3818_p7 }
  0x57   : > { %s3812_s25 = scalar_lea.hbm %s4719_s0, %s2997_s27  ;;  %s3480_s24 = scalar_lea.hbm %s4719_s0, 1024 }
  0x58   : > { %s3475_s27 = scalar_lea.hbm %s3812_s25, 256  ;;  %p3481_p2 = scmp.lt.u32.totalorder %s3812_s25, %s4719_s0 }
  0x59   : > { %p3476_p11 = scmp.ne.s32.totalorder %s3812_s25, %s3475_s27  ;;  %p3482_p3 = scmp.lt.u32.totalorder %s3480_s24, %s3475_s27 }
  0x5a   : > { %p3484_p9 = scmp.lt.u32.totalorder %s3475_s27, %s3812_s25 }
  0x5b   : > { %p3478_p13 = pnand %p3477_p12, %p3476_p11  ;;  %p3483_p6 = por %p3482_p3, %p3481_p2 }
  0x5d   : > { %p3479_p0 = pneg %p3478_p13  ;;  %p3485_p8 = por %p3484_p9, %p3483_p6 }
  0x5f   : > { %p3486_p1 = pnand %p3485_p8, %p3479_p0 }
  0x61   : > { %3489 = shalt.err (!%p3486_p1)
}
  0x62   : > { %s3490_s21 = scalar_lea.vmem %s3814_s15, 256  ;;  %s3633_s18 = smov [#allocation3]  }
  0x63   : > { %p3491_p4 = scmp.ne.s32.totalorder %s3814_s15, %s3490_s21  ;;  %s3495_s23 = sshll.u32 %s3633_s18, 4  ;;  %s3496_s23 = int_to_ptr.vmem [resolvable:$false] %s3495_s23 }
  0x64   : > { %s3497_s3 = scalar_lea.vmem %s3496_s23, 512  ;;  %p3498_p11 = scmp.lt.s32.totalorder %s3814_s15, %s3496_s23 }
  0x65   : > { %p3493_p5 = pnand %p3491_p4, %p3477_p12  ;;  %p3499_p13 = scmp.lt.s32.totalorder %s3497_s3, %s3490_s21 }
  0x67   : > { %p3494_p10 = pneg %p3493_p5  ;;  %p3500_p2 = por %p3499_p13, %p3498_p11 }
  0x69   : > { %p3501_p3 = pnand %p3500_p2, %p3494_p10 }
  0x6b   : > { %3504 = shalt.err (!%p3501_p3)
}
  0x6c   : > { %3081 = dma.hbm_to_vmem [thread:$0]  (!%p3818_p7), %s3812_s25, 256, %s3814_s15, %s301_s22  }
  0x6d   : > { %s325_s27 = scalar_lea.vmem [#allocation6], %s2877_s19  ;;  %s321_s26 = sand.u32 1, %s3627_s10  }
  0x6e   : > { %s333_s24 = sshll.u32 %s325_s27, 4  ;;  %s4721_s18 = sshll.u32 %s3623_s9, 13  ;;  %s3853_s24 = int_to_ptr.vmem [resolvable:$true] %s333_s24 }
  0x6f   : > { %s3860_s3 = scalar_lea.hbm %s4700_s1, %s4721_s18  ;;  %s3862_s0 = scalar_lea.sflag [#allocation7], %s321_s26 }
  0x70   : > { %s3505_s5 = scalar_lea.hbm %s3860_s3, 8192  ;;  %s3510_s15 = scalar_lea.hbm %s4700_s1, 32768 }
  0x71   : > { %p3506_p0 = scmp.ne.s32.totalorder %s3860_s3, %s3505_s5  ;;  %p3511_p8 = scmp.lt.u32.totalorder %s3860_s3, %s4700_s1 }
  0x72   : > { %p3512_p1 = scmp.lt.u32.totalorder %s3510_s15, %s3505_s5  ;;  %p3514_p5 = scmp.lt.u32.totalorder %s3505_s5, %s3860_s3 }
  0x73   : > { %p3508_p6 = pnand %p3506_p0, %p3477_p12 }
  0x74   : > { %p3513_p4 = por %p3512_p1, %p3511_p8 }
  0x75   : > { %p3509_p9 = pneg %p3508_p6 }
  0x76   : > { %p3515_p10 = por %p3514_p5, %p3513_p4 }
  0x78   : > { %p3516_p11 = pnand %p3515_p10, %p3509_p9 }
  0x7a   : > { %3519 = shalt.err (!%p3516_p11)
}
  0x7b   : > { %s3520_s27 = scalar_lea.vmem %s3853_s24, 8192  ;;  %s3634_s26 = smov [#allocation6]  }
  0x7c   : > { %p3521_p13 = scmp.ne.s32.totalorder %s3853_s24, %s3520_s27  ;;  %s3525_s18 = sshll.u32 %s3634_s26, 4  ;;  %s3526_s18 = int_to_ptr.vmem [resolvable:$false] %s3525_s18 }
  0x7d   : > { %s3527_s21 = scalar_lea.vmem %s3526_s18, 16384  ;;  %p3528_p0 = scmp.lt.s32.totalorder %s3853_s24, %s3526_s18 }
  0x7e   : > { %p3523_p2 = pnand %p3521_p13, %p3477_p12  ;;  %p3529_p6 = scmp.lt.s32.totalorder %s3527_s21, %s3520_s27 }
  0x80   : > { %p3524_p3 = pneg %p3523_p2  ;;  %p3530_p8 = por %p3529_p6, %p3528_p0 }
  0x82   : > { %p3531_p1 = pnand %p3530_p8, %p3524_p3 }
  0x84   : > { %3534 = shalt.err (!%p3531_p1)
}
  0x85   : > { %s3635_s5 = smov 128   ;;  %s3636_s23 = smov 8  }
  0x86   : > { %3084 = dma.hbm_to_vmem [thread:$0]  (!%p3818_p7), %s3860_s3, 8192, %s3853_s24, %s3862_s0, %s3635_s5, %s3635_s5, %s3636_s23  }
  0x87   : > { %p4722_p12 = scmp.ne.s32.totalorder %s4715_s13, 0 }
  0x88   : > { %s347_s16 = sand.u32 (!%p4722_p12), 1, %s3611_s28   ;;  %p4723_p9 = scmp.ne.s32.totalorder (!%p4722_p12), %s4714_s12, 0 }
  0x89   : > { %345 = sbr.rel (%p4722_p12) target bundleno = 1649 (0x671), region = 52  ;;  %s2882_s25 = sshll.u32 (!%p4722_p12), %s347_s16, 4 }
  0x8a   : > { %s348_s15 = scalar_lea.sflag (!%p4722_p12), [#allocation4], %s347_s16  ;;  %s3891_s19 = scalar_lea.vmem (!%p4722_p12), [#allocation3], %s2882_s25 }
  0x90   : > { %3586 = dma.done.wait (%p4723_p9), %s348_s15, 256  }
  0x91   : > { %3588 = vsyncadd (%p4723_p9), %s348_s15, 4294967040  ;;  %s356_s22 = sand.u32 1, %s3718_s11   ;;  %s2883_s17 = sshll.u32 %s347_s16, 9 }
  0x92   : > { %s357_s0 = scalar_lea.sflag [#allocation7], %s356_s22  ;;  %s3898_s24 = scalar_lea.vmem [#allocation6], %s2883_s17 }
  0x93   : > { %3590 = dma.done.wait (%p4723_p9), %s357_s0, 8192  }
  0x94   : > { %3592 = vsyncadd (%p4723_p9), %s357_s0, 4294959104  ;;  %p4724_p7 = scmp.eq.s32.totalorder %s3718_s11, 0 }
  0x96   : > { %3594 = dma.done.wait (%p4724_p7), [#allocation7], 2048   ;;  %p4725_p4 = pmov %p4724_p7 }
  0x98   : > { %3596 = vsyncadd (%p4725_p4), [#allocation7], 4294965248  ;;  %p4726_p5 = pmov %p4725_p4 }
  0x99   : > { %p4727_p10 = pmov %p4725_p4 }
  0x9a   : > { %3598 = dma.done.wait (%p4726_p5), [#allocation10], 2048  }
  0x9b   : > { %3600 = vsyncadd (%p4727_p10), [#allocation10], 4294965248  ;;  %p2886_p11 = scmp.ne.s32.totalorder %s3619_s30, 0 }
  0x9c   : > { %v3637_v0 = vmov (!%p2886_p11), 0.0  }
  0x9d   : > { %407 = sbr.rel (%p2886_p11) target bundleno = 164 (0xa4), region = 72  ;;  %408 = vst [vmem:[#allocation2] sm:$0xff] (!%p2886_p11), %v3637_v0  ;;  %409 = vst [vmem:[#allocation2 + $0x8] sm:$0xff] (!%p2886_p11), %v3637_v0 }
  0xa4 PF: > { %v3153_v1 = vld [vmem:[%s3898_s24 + $0x4] ss:$8 sps:$4 sm:$0xff]   ;;  %v3157_v3 = vld [vmem:[%s3898_s24] ss:$8 sps:$4 sm:$0xff]   ;;  %v3159_v5 = vld [vmem:[%s3898_s24 + $0x14] ss:$8 sps:$4 sm:$0xff]  }
  0xa5   : > { %v3155_v2 = vld [vmem:[%s3898_s24 + $0x104] ss:$8 sps:$4 sm:$0xff]   ;;  %812 = vmatprep.subr.bf16.mxu0 %v3153_v1  ;;  %v3158_v4 = vld [vmem:[%s3898_s24 + $0x100] ss:$8 sps:$4 sm:$0xff]   ;;  %v3161_v6 = vld [vmem:[%s3898_s24 + $0x114] ss:$8 sps:$4 sm:$0xff]  }
  0xa6   : > { %853 = vmatprep.subr.bf16.mxu1 %v3155_v2  ;;  %813 = vmatpush1.bf16.msra.mxu0 %v3157_v3  ;;  %v3163_v7 = vld [vmem:[%s3898_s24 + $0x10] ss:$8 sps:$4 sm:$0xff]   ;;  %v3165_v9 = vld [vmem:[%s3898_s24 + $0x24] ss:$8 sps:$4 sm:$0xff]   ;;  %v3169_v11 = vld [vmem:[%s3898_s24 + $0x20] ss:$8 sps:$4 sm:$0xff]  }
  0xa7   : > { %854 = vmatpush1.bf16.msra.mxu1 %v3158_v4  ;;  %814 = vmatprep.subr.bf16.mxu0 %v3159_v5  ;;  %v3164_v8 = vld [vmem:[%s3898_s24 + $0x110] ss:$8 sps:$4 sm:$0xff]   ;;  %v3167_v10 = vld [vmem:[%s3898_s24 + $0x124] ss:$8 sps:$4 sm:$0xff]   ;;  %v3170_v12 = vld [vmem:[%s3898_s24 + $0x120] ss:$8 sps:$4 sm:$0xff]  }
  0xa8   : > { %855 = vmatprep.subr.bf16.mxu1 %v3161_v6  ;;  %v3171_v13 = vld [vmem:[%s3898_s24 + $0x34] ss:$8 sps:$4 sm:$0xff]   ;;  %v3175_v15 = vld [vmem:[%s3898_s24 + $0x30] ss:$8 sps:$4 sm:$0xff]   ;;  %v3177_v17 = vld [vmem:[%s3898_s24 + $0x44] ss:$8 sps:$4 sm:$0xff]  }
  0xa9   : > { %v3173_v14 = vld [vmem:[%s3898_s24 + $0x134] ss:$8 sps:$4 sm:$0xff]   ;;  %v3176_v16 = vld [vmem:[%s3898_s24 + $0x130] ss:$8 sps:$4 sm:$0xff]   ;;  %v3179_v18 = vld [vmem:[%s3898_s24 + $0x144] ss:$8 sps:$4 sm:$0xff]  }
  0xaa   : > { %815 = vmatpush1.bf16.msra.mxu0 %v3163_v7  ;;  %v3181_v19 = vld [vmem:[%s3898_s24 + $0x40] ss:$8 sps:$4 sm:$0xff]   ;;  %v3183_v21 = vld [vmem:[%s3898_s24 + $0x54] ss:$8 sps:$4 sm:$0xff]   ;;  %v3187_v23 = vld [vmem:[%s3898_s24 + $0x50] ss:$8 sps:$4 sm:$0xff]  }
  0xab   : > { %856 = vmatpush1.bf16.msra.mxu1 %v3164_v8  ;;  %816 = vmatprep.subr.bf16.mxu0 %v3165_v9  ;;  %v3182_v20 = vld [vmem:[%s3898_s24 + $0x140] ss:$8 sps:$4 sm:$0xff]   ;;  %v3185_v22 = vld [vmem:[%s3898_s24 + $0x154] ss:$8 sps:$4 sm:$0xff]   ;;  %v3188_v24 = vld [vmem:[%s3898_s24 + $0x150] ss:$8 sps:$4 sm:$0xff]  }
  0xac   : > { %857 = vmatprep.subr.bf16.mxu1 %v3167_v10  ;;  %v3189_v25 = vld [vmem:[%s3898_s24 + $0x64] ss:$8 sps:$4 sm:$0xff]   ;;  %v3193_v27 = vld [vmem:[%s3898_s24 + $0x60] ss:$8 sps:$4 sm:$0xff]   ;;  %v3195_v29 = vld [vmem:[%s3898_s24 + $0x74] ss:$8 sps:$4 sm:$0xff]  }
  0xad   : > { %v3191_v26 = vld [vmem:[%s3898_s24 + $0x164] ss:$8 sps:$4 sm:$0xff]   ;;  %v3194_v28 = vld [vmem:[%s3898_s24 + $0x160] ss:$8 sps:$4 sm:$0xff]   ;;  %v3197_v30 = vld [vmem:[%s3898_s24 + $0x174] ss:$8 sps:$4 sm:$0xff]  }
  0xae   : > { %817 = vmatpush1.bf16.msra.mxu0 %v3169_v11  ;;  %v3199_v31 = vld [vmem:[%s3898_s24 + $0x70] ss:$8 sps:$4 sm:$0xff]   ;;  %v3201_v33 = vld [vmem:[%s3898_s24 + $0x84] ss:$8 sps:$4 sm:$0xff]   ;;  %v3205_v35 = vld [vmem:[%s3898_s24 + $0x80] ss:$8 sps:$4 sm:$0xff]  }
  0xaf   : > { %858 = vmatpush1.bf16.msra.mxu1 %v3170_v12  ;;  %818 = vmatprep.subr.bf16.mxu0 %v3171_v13  ;;  %v3200_v32 = vld [vmem:[%s3898_s24 + $0x170] ss:$8 sps:$4 sm:$0xff]   ;;  %v3203_v34 = vld [vmem:[%s3898_s24 + $0x184] ss:$8 sps:$4 sm:$0xff]   ;;  %v3206_v36 = vld [vmem:[%s3898_s24 + $0x180] ss:$8 sps:$4 sm:$0xff]  }
  0xb0   : > { %859 = vmatprep.subr.bf16.mxu1 %v3173_v14  ;;  %v3207_v37 = vld [vmem:[%s3898_s24 + $0x94] ss:$8 sps:$4 sm:$0xff]   ;;  %v3211_v39 = vld [vmem:[%s3898_s24 + $0x90] ss:$8 sps:$4 sm:$0xff]   ;;  %v3213_v41 = vld [vmem:[%s3898_s24 + $0xa4] ss:$8 sps:$4 sm:$0xff]  }
  0xb1   : > { %v3209_v38 = vld [vmem:[%s3898_s24 + $0x194] ss:$8 sps:$4 sm:$0xff]   ;;  %v3212_v40 = vld [vmem:[%s3898_s24 + $0x190] ss:$8 sps:$4 sm:$0xff]   ;;  %v3215_v42 = vld [vmem:[%s3898_s24 + $0x1a4] ss:$8 sps:$4 sm:$0xff]  }
  0xb2   : > { %819 = vmatpush1.bf16.msra.mxu0 %v3175_v15  ;;  %v3217_v43 = vld [vmem:[%s3898_s24 + $0xa0] ss:$8 sps:$4 sm:$0xff]   ;;  %v3219_v45 = vld [vmem:[%s3898_s24 + $0xb4] ss:$8 sps:$4 sm:$0xff]   ;;  %v3223_v50 = vld [vmem:[%s3898_s24 + $0xb0] ss:$8 sps:$4 sm:$0xff]  }
  0xb3   : > { %860 = vmatpush1.bf16.msra.mxu1 %v3176_v16  ;;  %820 = vmatprep.subr.bf16.mxu0 %v3177_v17  ;;  %v3218_v44 = vld [vmem:[%s3898_s24 + $0x1a0] ss:$8 sps:$4 sm:$0xff]   ;;  %v3221_v46 = vld [vmem:[%s3898_s24 + $0x1b4] ss:$8 sps:$4 sm:$0xff]   ;;  %v3224_v51 = vld [vmem:[%s3898_s24 + $0x1b0] ss:$8 sps:$4 sm:$0xff]  }
  0xb4   : > { %861 = vmatprep.subr.bf16.mxu1 %v3179_v18  ;;  %v412_v47 = vld [vmem:[%s3891_s19] sm:$0xff]  ;;  %v413_v49 = vld [vmem:[%s3891_s19 + $0x8] sm:$0xff]  ;;  %p2955_p13 = scmp.ne.s32.totalorder %s3619_s30, 3 }
  0xb5   : > { %v2888_v48 = vcombine.high %v412_v47, %v412_v47  ;;  %v2890_v52 = vcombine.high %v413_v49, %v413_v49  ;;  %v3225_v53 = vld [vmem:[%s3898_s24 + $0xc4] ss:$8 sps:$4 sm:$0xff]   ;;  %v3229_v55 = vld [vmem:[%s3898_s24 + $0xc0] ss:$8 sps:$4 sm:$0xff]   ;;  %v3231_v57 = vld [vmem:[%s3898_s24 + $0xd4] ss:$8 sps:$4 sm:$0xff]   ;;  %v2887_v5 = vcombine.low %v412_v47, %v412_v47  ;;  %v2889_v6 = vcombine.low %v413_v49, %v413_v49 }
  0xb6   : > { %821 = vmatpush1.bf16.msra.mxu0 %v3181_v19  ;;  %v3227_v54 = vld [vmem:[%s3898_s24 + $0x1c4] ss:$8 sps:$4 sm:$0xff]   ;;  %v3230_v56 = vld [vmem:[%s3898_s24 + $0x1c0] ss:$8 sps:$4 sm:$0xff]   ;;  %v3233_v58 = vld [vmem:[%s3898_s24 + $0x1d4] ss:$8 sps:$4 sm:$0xff]  }
  0xb7   : > { %862 = vmatpush1.bf16.msra.mxu1 %v3182_v20  ;;  %822 = vmatprep.subr.bf16.mxu0 %v3183_v21  ;;  %v3235_v59 = vld [vmem:[%s3898_s24 + $0xd0] ss:$8 sps:$4 sm:$0xff]   ;;  %v3237_v61 = vld [vmem:[%s3898_s24 + $0xe4] ss:$8 sps:$4 sm:$0xff]   ;;  %v3241_v63 = vld [vmem:[%s3898_s24 + $0xe0] ss:$8 sps:$4 sm:$0xff]  }
  0xb8   : > { %863 = vmatprep.subr.bf16.mxu1 %v3185_v22  ;;  %844 = vmatprep.mubr.bf16.mxu0 %v2888_v48  ;;  %v3236_v60 = vld [vmem:[%s3898_s24 + $0x1d0] ss:$8 sps:$4 sm:$0xff]   ;;  %v3239_v62 = vld [vmem:[%s3898_s24 + $0x1e4] ss:$8 sps:$4 sm:$0xff]   ;;  %v3242_v0 = vld [vmem:[%s3898_s24 + $0x1e0] ss:$8 sps:$4 sm:$0xff]  }
  0xb9   : > { %885 = vmatprep.mubr.bf16.mxu1 %v2890_v52  ;;  %v3243_v1 = vld [vmem:[%s3898_s24 + $0xf4] ss:$8 sps:$4 sm:$0xff]   ;;  %v3247_v3 = vld [vmem:[%s3898_s24 + $0xf0] ss:$8 sps:$4 sm:$0xff]   ;;  %v3253_v21 = vld [vmem:[#allocation8 + $0x40] sm:$0xff] (!%p2955_p13)   ;;  %vm1097_vm0 = vcmask (!%p2955_p13), 523520  }
  0xba   : > { %823 = vmatpush1.bf16.msra.mxu0 %v3187_v23  ;;  %v3245_v2 = vld [vmem:[%s3898_s24 + $0x1f4] ss:$8 sps:$4 sm:$0xff]   ;;  %v3248_v4 = vld [vmem:[%s3898_s24 + $0x1f0] ss:$8 sps:$4 sm:$0xff]   ;;  %v3254_v22 = vld [vmem:[#allocation8] sm:$0xff] (!%p2955_p13)   ;;  %s3639_s27 = smov (!%p2955_p13), 32  }
  0xbb   : > { %864 = vmatpush1.bf16.msra.mxu1 %v3188_v24  ;;  %824 = vmatprep.subr.bf16.mxu0 %v3189_v25  ;;  %v410_v8 = vld [vmem:[#allocation2] sm:$0xff]  ;;  %v411_v12 = vld [vmem:[#allocation2 + $0x8] sm:$0xff]  ;;  %v3255_v23 = vld [vmem:[#allocation8 + $0x48] sm:$0xff] (!%p2955_p13)   ;;  %s3640_s26 = smov (!%p2955_p13), 96   ;;  %vm1830_vm2 = vcmask (!%p2955_p13), 261120   ;;  %vm3642_vm3 = vmmov (!%p2955_p13), 0  }
  0xbc   : > { %865 = vmatprep.subr.bf16.mxu1 %v3191_v26  ;;  %v3256_v24 = vld [vmem:[#allocation8 + $0x8] sm:$0xff] (!%p2955_p13)   ;;  %v3257_v25 = vld [vmem:[#allocation8 + $0x50] sm:$0xff] (!%p2955_p13)   ;;  %v906_v26 = vlaneseq (!%p2955_p13)  ;;  %v3268_v47 = vld [vmem:[#allocation8 + $0x38] sm:$0xff] (!%p2955_p13)   ;;  %vm2533_vm4 = vcmask (!%p2955_p13), 130112   ;;  %vm2540_vm5 = vcmask (!%p2955_p13), 195712   ;;  %vm2547_vm6 = vcmask (!%p2955_p13), 261312  }
  0xbd   : > { %vm2682_vm7 = vcmask (!%p2955_p13), 1041409   ;;  %vm2684_vm8 = vcmask (!%p2955_p13), 1042434   ;;  %vm2686_vm9 = vcmask (!%p2955_p13), 1043459   ;;  %vm2688_vm10 = vcmask (!%p2955_p13), 1044484  }
  0xbe   : > { %825 = vmatpush1.bf16.msra.mxu0 %v3193_v27  ;;  %v3258_v27 = vld [vmem:[#allocation8 + $0x10] sm:$0xff] (!%p2955_p13)   ;;  %vm2690_vm11 = vcmask (!%p2955_p13), 1045509   ;;  %vm2692_vm12 = vcmask (!%p2955_p13), 1046534   ;;  %vm2694_vm13 = vcmask (!%p2955_p13), 1047559  }
  0xbf   : > { %866 = vmatpush1.bf16.msra.mxu1 %v3194_v28  ;;  %826 = vmatprep.subr.bf16.mxu0 %v3195_v29  ;;  %v3259_v28 = vld [vmem:[#allocation8 + $0x58] sm:$0xff] (!%p2955_p13)   ;;  %v3981_v29 = vshrl.u32 (!%p2955_p13), %v906_v26, 7 }
  0xc0   : > { %867 = vmatprep.subr.bf16.mxu1 %v3197_v30  ;;  %v3260_v30 = vld [vmem:[#allocation8 + $0x18] sm:$0xff] (!%p2955_p13)  }
  0xc2   : > { %827 = vmatpush1.bf16.msra.mxu0 %v3199_v31  ;;  %v3261_v31 = vld [vmem:[#allocation8 + $0x60] sm:$0xff] (!%p2955_p13)  }
  0xc3   : > { %868 = vmatpush1.bf16.msra.mxu1 %v3200_v32  ;;  %828 = vmatprep.subr.bf16.mxu0 %v3201_v33  ;;  %v3984_v32 = vsub.s32 (!%p2955_p13), 0, %v3981_v29  ;;  %v3987_v33 = vsub.s32 (!%p2955_p13), 1, %v3981_v29 }
  0xc4   : > { %869 = vmatprep.subr.bf16.mxu1 %v3203_v34  ;;  %v3262_v34 = vld [vmem:[#allocation8 + $0x20] sm:$0xff] (!%p2955_p13)  }
  0xc6   : > { %829 = vmatpush1.bf16.msra.mxu0 %v3205_v35  ;;  %v3263_v35 = vld [vmem:[#allocation8 + $0x68] sm:$0xff] (!%p2955_p13)  }
  0xc7   : > { %870 = vmatpush1.bf16.msra.mxu1 %v3206_v36  ;;  %830 = vmatprep.subr.bf16.mxu0 %v3207_v37  ;;  %v904_v37 = vld [vmem:[%s4701_s2] sm:$0x3] (!%p2955_p13) }
  0xc8   : > { %871 = vmatprep.subr.bf16.mxu1 %v3209_v38 }
  0xca   : > { %831 = vmatpush1.bf16.msra.mxu0 %v3211_v39  ;;  %v3264_v39 = vld [vmem:[#allocation8 + $0x28] sm:$0xff] (!%p2955_p13)  }
  0xcb   : > { %872 = vmatpush1.bf16.msra.mxu1 %v3212_v40  ;;  %832 = vmatprep.subr.bf16.mxu0 %v3213_v41  ;;  %v909_v40 = vrot.slane (!%p2955_p13), %v904_v37, %v3984_v32  ;;  %v913_v41 = vrot.slane (!%p2955_p13), %v904_v37, %v3987_v33 }
  0xcc   : > { %873 = vmatprep.subr.bf16.mxu1 %v3215_v42  ;;  %v3265_v42 = vld [vmem:[#allocation8 + $0x70] sm:$0xff] (!%p2955_p13)  }
  0xce   : > { %833 = vmatpush1.bf16.msra.mxu0 %v3217_v43 }
  0xcf   : > { %874 = vmatpush1.bf16.msra.mxu1 %v3218_v44  ;;  %834 = vmatprep.subr.bf16.mxu0 %v3219_v45  ;;  %v3266_v45 = vld [vmem:[#allocation8 + $0x30] sm:$0xff] (!%p2955_p13)  }
  0xd0   : > { %875 = vmatprep.subr.bf16.mxu1 %v3221_v46  ;;  %v3267_v46 = vld [vmem:[#allocation8 + $0x78] sm:$0xff] (!%p2955_p13)  }
  0xd2   : > { %835 = vmatpush1.bf16.msra.mxu0 %v3223_v50 }
  0xd3   : > { %876 = vmatpush1.bf16.msra.mxu1 %v3224_v51  ;;  %836 = vmatprep.subr.bf16.mxu0 %v3225_v53  ;;  %v2956_v53 = vld [vmem:[%s4703_s4] ss:$0 sm:$0xff] (!%p2955_p13) }
  0xd4   : > { %877 = vmatprep.subr.bf16.mxu1 %v3227_v54 }
  0xd6   : > { %837 = vmatpush1.bf16.msra.mxu0 %v3229_v55 }
  0xd7   : > { %878 = vmatpush1.bf16.msra.mxu1 %v3230_v56  ;;  %838 = vmatprep.subr.bf16.mxu0 %v3231_v57 }
  0xd8   : > { %879 = vmatprep.subr.bf16.mxu1 %v3233_v58 }
  0xda   : > { %839 = vmatpush1.bf16.msra.mxu0 %v3235_v59 }
  0xdb   : > { %880 = vmatpush1.bf16.msra.mxu1 %v3236_v60  ;;  %840 = vmatprep.subr.bf16.mxu0 %v3237_v61 }
  0xdc   : > { %881 = vmatprep.subr.bf16.mxu1 %v3239_v62 }
  0xde   : > { %841 = vmatpush1.bf16.msra.mxu0 %v3241_v63  ;;  %v1150_v63 = vsub.s32 (!%p2955_p13), 2, %v3981_v29 }
  0xdf   : > { %882 = vmatpush1.bf16.msra.mxu1 %v3242_v0  ;;  %842 = vmatprep.subr.bf16.mxu0 %v3243_v1  ;;  %v1170_v1 = vsub.s32 (!%p2955_p13), 3, %v3981_v29 }
  0xe0   : > { %883 = vmatprep.subr.bf16.mxu1 %v3245_v2 }
  0xe2   : > { %843 = vmatpush1.bf16.msra.mxu0 %v3247_v3  ;;  %v1190_v3 = vsub.s32 (!%p2955_p13), 4, %v3981_v29 }
  0xe3   : > { %884 = vmatpush1.bf16.msra.mxu1 %v3248_v4  ;;  %3000 = vmatprep.subr.bf16.mxu0 (!%p2955_p13), %v3253_v21 }
  0xe5   : > { %845 = vmatmul.mubr.bf16.vlgmr.msra.gmra.mrb[0].mxu0 %v2887_v5  ;;  %v1210_v5 = vsub.s32 (!%p2955_p13), 5, %v3981_v29 }
  0xe6   : > { %886 = vmatmul.mubr.bf16.vlgmr.msra.gmra.mrb[0].mxu1 %v2889_v6  ;;  %3001 = vmatpush3.bf16.msra.mxu0 (!%p2955_p13), %v3254_v22 }
  0xe7   : > { %3002 = vmatprep.subr.bf16.mxu0 (!%p2955_p13), %v3255_v23 }
  0xea   : > { %3003 = vmatpush3.bf16.msra.mxu0 (!%p2955_p13), %v3256_v24 }
  0xeb   : > { %3004 = vmatprep.subr.bf16.mxu0 (!%p2955_p13), %v3257_v25 }
  0xee   : > { %3005 = vmatpush3.bf16.msra.mxu0 (!%p2955_p13), %v3258_v27 }
  0xef   : > { %3006 = vmatprep.subr.bf16.mxu0 (!%p2955_p13), %v3259_v28 }
  0xf2   : > { %3007 = vmatpush3.bf16.msra.mxu0 (!%p2955_p13), %v3260_v30 }
  0xf3   : > { %3008 = vmatprep.subr.bf16.mxu0 (!%p2955_p13), %v3261_v31 }
  0xf6   : > { %3009 = vmatpush3.bf16.msra.mxu0 (!%p2955_p13), %v3262_v34 }
  0xf7   : > { %3010 = vmatprep.subr.bf16.mxu0 (!%p2955_p13), %v3263_v35 }
  0xfa   : > { %3011 = vmatpush3.bf16.msra.mxu0 (!%p2955_p13), %v3264_v39 }
  0xfb   : > { %3012 = vmatprep.subr.bf16.mxu0 (!%p2955_p13), %v3265_v42 }
  0xfe   : > { %3013 = vmatpush3.bf16.msra.mxu0 (!%p2955_p13), %v3266_v45 }
  0xff   : > { %3014 = vmatprep.subr.bf16.mxu0 (!%p2955_p13), %v3267_v46 }
 0x102   : > { %3015 = vmatpush3.bf16.msra.mxu0 (!%p2955_p13), %v3268_v47 }
 0x1b8   : > { %v846_v7 = vpop.f32.mrb[0].mxu0 }
 0x1b9   : > { %v887_v9 = vpop.f32.mrb[0].mxu1  ;;  %v848_v11 = vpop.f32.mrb[1].mxu0  ;;  %901 = sbr.rel (%p2955_p13) target bundleno = 1624 (0x658), region = 76 }
 0x1ba   : > { %v888_v10 = vadd.f32 %v887_v9, %v846_v7  ;;  %v889_v13 = vpop.f32.mrb[1].mxu1  ;;  %v850_v15 = vpop.f32.mrb[2].mxu0  ;;  %v3638_v7 = vmov (!%p2955_p13), 1966171168   ;;  %v1230_v9 = vsub.s32 (!%p2955_p13), 6, %v3981_v29 }
 0x1bb   : > { %v890_v14 = vadd.f32 %v889_v13, %v848_v11  ;;  %v891_v16 = vpop.f32.mrb[2].mxu1  ;;  %v851_v18 = vpop.f32.mrb[3].mxu0  ;;  %v1250_v13 = vsub.s32 (!%p2955_p13), 7, %v3981_v29 }
 0x1bc   : > { %v894_v17 = vadd.f32 %v888_v10, %v410_v8  ;;  %v892_v19 = vpop.f32.mrb[3].mxu1  ;;  %v1271_v8 = vunpack.c.l.s4 (!%p2955_p13), %v3638_v7 }
 0x1bd   : > { %v895_v20 = vadd.f32 %v890_v14, %v411_v12 }
 0x1be   : > { %896 = vst [vmem:[#allocation2] sm:$0xff] %v894_v17  ;;  %v1272_v10 = vunpack.c.0.s8 (!%p2955_p13), %v1271_v8 }
 0x1bf   : > { %897 = vst [vmem:[#allocation2 + $0x8] sm:$0xff] %v895_v20 }
 0x1c0   : > { %v1275_v12 = vsub.s32 %v1272_v10, %v3981_v29 }
 0x1c5   : > { %v902_v38 = vld [vmem:[#allocation2] sm:$0xff] }
 0x1c6   : > { %v903_v36 = vld [vmem:[#allocation2 + $0x8] sm:$0xff]  ;;  %v916_v44 = vadd.f32 %v909_v40, %v902_v38 }
 0x1c7   : > { %v917_v43 = vadd.f32 %v913_v41, %v903_v36 }
 0x1c9   : > { %3287 = vtanh.f32 %v917_v43 }
 0x1ca   : > { %3289 = vtanh.f32 %v916_v44 }
 0x1d3   : > { %v3288_v48 = vpop.eup %3287 }
 0x1d4   : > { %v3290_v49 = vpop.eup %3289  ;;  %v921_v50 = vpack.c.bf16 %v3288_v48, %v3288_v48 }
 0x1d5   : > { %v3994_v51 = vpack.c.bf16 %v3290_v49, %v3290_v49 }
 0x1d6   : > { %1089 = vmatprep.mubr.bf16.mxu0 %v921_v50  ;;  %2446 = vmatprep.mubr.bf16.mxu1 %v921_v50 }
 0x1d7   : > { %1090 = vmatmul.mubr.bf16.vlgmr.msra.gmra.mrb[0].mxu0 %v3994_v51 }
 0x2aa   : > { %v3016_v52 = vpop.f32.mrb[0].mxu0 }
 0x2ab   : > { %v3017_v54 = vpop.f32.mrb[1].mxu0 }
 0x2ac   : > { %v3018_v55 = vadd.f32 %v3017_v54, %v3016_v52  ;;  %v3019_v56 = vpop.f32.mrb[2].mxu0 }
 0x2ad   : > { %v3020_v57 = vpop.f32.mrb[3].mxu0 }
 0x2ae   : > { %v4000_v58 = vadd.f32 %v3018_v55, %v2956_v53 }
 0x2b0   : > { %v1098_v59 = vsel %vm1097_vm0, %v4000_v58, -inf  ;;  %v1111_v60 = vrot.slane %v4000_v58, %v3984_v32  ;;  %v1101_v61 = vsel %vm1097_vm0, %v4000_v58, inf  ;;  %v1131_v62 = vrot.slane %v4000_v58, %v3987_v33 }
 0x2b1   : > { %1099 = vmax.xlane.f32.xlu0 %v1098_v59  ;;  %v1151_v0 = vrot.slane %v4000_v58, %v1150_v63  ;;  %v1171_v2 = vrot.slane %v4000_v58, %v1170_v1  ;;  %v1191_v4 = vrot.slane %v4000_v58, %v1190_v3  ;;  %v1211_v6 = vrot.slane %v4000_v58, %v1210_v5 }
 0x2b2   : > { %1114 = vbcast.lane.b32.xlu1 %v1111_v60, 320  ;;  %v1231_v11 = vrot.slane %v4000_v58, %v1230_v9  ;;  %v1276_v14 = vrot.slane %v4000_v58, %v1275_v12  ;;  %v1251_v15 = vrot.slane %v4000_v58, %v1250_v13  ;;  %v1269_v17 = vcombine.high %v4000_v58, %v4000_v58 }
 0x2b3   : > { %vm1104_vm1 = vcmp.ge.f32.partialorder %v4000_v58, 0.0 }
 0x2b4   : > { %v1284_v16 = vcombine.high %v1276_v14, %v1276_v14  ;;  %v1292_v18 = vrot.slane %v1276_v14, %v1275_v12  ;;  %v1283_v20 = vrot.slane %v1269_v17, %v1275_v12 }
 0x2b5   : > { %1102 = vmin.xlane.f32.xlu0 %v1101_v61 }
 0x2b6   : > { %1118 = vbcast.lane.b32.xlu1 %v1111_v60, 328  ;;  %v1306_v19 = vrot.slane %v1284_v16, %v1275_v12  ;;  %v4037_v21 = vrot.slane %v1292_v18, %v3984_v32  ;;  %v1314_v22 = vcombine.high %v1292_v18, %v1292_v18  ;;  %v1285_v25 = vcombine.high %v1283_v20, %v1283_v20 }
 0x2b7   : > { %v1299_v28 = vrot.slane %v1283_v20, %v1275_v12 }
 0x2b8   : > { %v4040_v23 = vrot.slane %v1306_v19, %v3984_v32  ;;  %v1316_v24 = vcombine.high %v1306_v19, %v1306_v19  ;;  %v4045_v27 = vrot.slane %v1314_v22, %v3984_v32  ;;  %v1313_v31 = vrot.slane %v1285_v25, %v1275_v12 }
 0x2b9   : > { %v4053_v34 = vrot.slane %v1299_v28, %v3984_v32  ;;  %v1315_v35 = vcombine.high %v1299_v28, %v1299_v28 }
 0x2ba   : > { %1138 = vbcast.lane.b32.xlu1 %v1131_v62, 328  ;;  %v4048_v30 = vrot.slane %v1316_v24, %v3984_v32  ;;  %v4056_v36 = vrot.slane %v1313_v31, %v3984_v32  ;;  %v1317_v37 = vcombine.high %v1313_v31, %v1313_v31 }
 0x2bb   : > { %v4061_v38 = vrot.slane %v1315_v35, %v3984_v32 }
 0x2bc   : > { %v4064_v39 = vrot.slane %v1317_v37, %v3984_v32 }
 0x2be   : > { %1122 = vbcast.lane.b32.xlu1 %v1111_v60, 336 }
 0x2c2   : > { %1126 = vbcast.lane.b32.xlu1 %v1111_v60, 344 }
 0x2c6   : > { %1142 = vbcast.lane.b32.xlu1 %v1131_v62, 336 }
 0x2ca   : > { %1146 = vbcast.lane.b32.xlu1 %v1131_v62, 344 }
 0x2cb   : > { %1134 = vbcast.lane.b32.xlu0 %v1131_v62, 320 }
 0x2ce   : > { %1154 = vbcast.lane.b32.xlu1 %v1151_v0, 320 }
 0x2cf   : > { %1158 = vbcast.lane.b32.xlu0 %v1151_v0, 328 }
 0x2d2   : > { %1162 = vbcast.lane.b32.xlu1 %v1151_v0, 336 }
 0x2d3   : > { %1166 = vbcast.lane.b32.xlu0 %v1151_v0, 344 }
 0x2d6   : > { %1174 = vbcast.lane.b32.xlu1 %v1171_v2, 320 }
 0x2d7   : > { %1178 = vbcast.lane.b32.xlu0 %v1171_v2, 328 }
 0x2da   : > { %1182 = vbcast.lane.b32.xlu1 %v1171_v2, 336 }
 0x2db   : > { %1186 = vbcast.lane.b32.xlu0 %v1171_v2, 344 }
 0x2de   : > { %1194 = vbcast.lane.b32.xlu1 %v1191_v4, 320 }
 0x2df   : > { %1198 = vbcast.lane.b32.xlu0 %v1191_v4, 328 }
 0x2e2   : > { %1202 = vbcast.lane.b32.xlu1 %v1191_v4, 336 }
 0x2e3   : > { %1206 = vbcast.lane.b32.xlu0 %v1191_v4, 344 }
 0x2e6   : > { %1214 = vbcast.lane.b32.xlu1 %v1211_v6, 320 }
 0x2e7   : > { %1218 = vbcast.lane.b32.xlu0 %v1211_v6, 328 }
 0x2ea   : > { %1222 = vbcast.lane.b32.xlu1 %v1211_v6, 336 }
 0x2eb   : > { %1226 = vbcast.lane.b32.xlu0 %v1211_v6, 344 }
 0x2ee   : > { %1234 = vbcast.lane.b32.xlu1 %v1231_v11, 320 }
 0x2ef   : > { %1238 = vbcast.lane.b32.xlu0 %v1231_v11, 328 }
 0x2f2   : > { %1242 = vbcast.lane.b32.xlu1 %v1231_v11, 336 }
 0x2f3   : > { %1246 = vbcast.lane.b32.xlu0 %v1231_v11, 344 }
 0x2f6   : > { %1254 = vbcast.lane.b32.xlu1 %v1251_v15, 320 }
 0x2f7   : > { %1258 = vbcast.lane.b32.xlu0 %v1251_v15, 328 }
 0x2fa   : > { %1262 = vbcast.lane.b32.xlu1 %v1251_v15, 336 }
 0x2fb   : > { %1266 = vbcast.lane.b32.xlu0 %v1251_v15, 344 }
 0x2fe   : > { %1646 = vrot.lane.b32.xlu1 %v4037_v21, %s3639_s27 }
 0x2ff   : > { %1648 = vrot.lane.b32.xlu0 %v4040_v23, %s3639_s27 }
 0x302   : > { %1650 = vrot.lane.b32.xlu1 %v4045_v27, %s3639_s27 }
 0x303   : > { %1652 = vrot.lane.b32.xlu0 %v4048_v30, %s3639_s27 }
 0x306   : > { %1654 = vrot.lane.b32.xlu1 %v4053_v34, %s3639_s27 }
 0x307   : > { %1656 = vrot.lane.b32.xlu0 %v4056_v36, %s3639_s27 }
 0x30a   : > { %1658 = vrot.lane.b32.xlu1 %v4061_v38, %s3639_s27 }
 0x30b   : > { %1660 = vrot.lane.b32.xlu0 %v4064_v39, %s3639_s27 }
 0x324   : > { %v4068_v40 = vpop.permute.xlu1 %1114 }
 0x328   : > { %v4070_v41 = vpop.permute.xlu1 %1118 }
 0x32c   : > { %v4072_v42 = vpop.permute.xlu1 %1138 }
 0x330   : > { %v4076_v47 = vpop.permute.xlu1 %1122 }
 0x334   : > { %v4080_v50 = vpop.permute.xlu1 %1126 }
 0x338   : > { %v4083_v53 = vpop.permute.xlu1 %1142 }
 0x33c   : > { %v4085_v54 = vpop.permute.xlu1 %1146 }
 0x33e   : > { %v1100_v43 = vpop.xlane.xlu0 %1099 }
 0x33f   : > { %v1105_v45 = vmul.f32 %v1100_v43, %v4000_v58  ;;  %v1358_v43 = vmul.f32 %v4037_v21, %v4068_v40 }
 0x340   : > { %v4091_v56 = vpop.permute.xlu1 %1154 }
 0x342   : > { %v1103_v44 = vpop.xlane.xlu0 %1102 }
 0x343   : > { %v1106_v46 = vmul.f32 %v1103_v44, %v4000_v58  ;;  %v1359_v44 = vmul.f32 %v4037_v21, %v4070_v41  ;;  %v1360_v41 = vmul.f32 %v4037_v21, %v4076_v47 }
 0x344   : > { %v4097_v58 = vpop.permute.xlu1 %1162 }
 0x345   : > { %v1107_v48 = vsel %vm1104_vm1, %v1105_v45, %v1106_v46 }
 0x346   : > { %v1393_v49 = vrot.slane %v1107_v48, %v3984_v32  ;;  %v1413_v52 = vrot.slane %v1107_v48, %v3987_v33  ;;  %v4087_v55 = vpop.permute.xlu0 %1134  ;;  %v1433_v32 = vrot.slane %v1107_v48, %v1150_v63  ;;  %v1453_v57 = vrot.slane %v1107_v48, %v1170_v1 }
 0x347   : > { %v1473_v60 = vrot.slane %v1107_v48, %v1190_v3  ;;  %v1493_v1 = vrot.slane %v1107_v48, %v1210_v5  ;;  %v1513_v4 = vrot.slane %v1107_v48, %v1230_v9  ;;  %v1533_v5 = vrot.slane %v1107_v48, %v1250_v13 }
 0x348   : > { %1400 = vbcast.lane.b32.xlu0 %v1393_v49, 328  ;;  %1396 = vbcast.lane.b32.xlu1 %v1393_v49, 320  ;;  %v4103_v61 = vpop.permute.xlu1 %1174 }
 0x34a   : > { %v4093_v33 = vpop.permute.xlu0 %1158 }
 0x34c   : > { %1420 = vbcast.lane.b32.xlu0 %v1413_v52, 328  ;;  %1416 = vbcast.lane.b32.xlu1 %v1413_v52, 320  ;;  %v4107_v63 = vpop.permute.xlu1 %1182 }
 0x34e   : > { %v4099_v59 = vpop.permute.xlu0 %1166 }
 0x350   : > { %1408 = vbcast.lane.b32.xlu0 %v1393_v49, 344  ;;  %1404 = vbcast.lane.b32.xlu1 %v1393_v49, 336  ;;  %v4113_v2 = vpop.permute.xlu1 %1194 }
 0x352   : > { %v4105_v62 = vpop.permute.xlu0 %1178 }
 0x354   : > { %1428 = vbcast.lane.b32.xlu0 %v1413_v52, 344  ;;  %1424 = vbcast.lane.b32.xlu1 %v1413_v52, 336  ;;  %v4119_v6 = vpop.permute.xlu1 %1202  ;;  %v1363_v52 = vmul.f32 %v4040_v23, %v4072_v42 }
 0x356   : > { %v4109_v0 = vpop.permute.xlu0 %1186 }
 0x358   : > { %1440 = vbcast.lane.b32.xlu0 %v1433_v32, 328  ;;  %1436 = vbcast.lane.b32.xlu1 %v1433_v32, 320  ;;  %v4125_v8 = vpop.permute.xlu1 %1214 }
 0x35a   : > { %v4115_v3 = vpop.permute.xlu0 %1198 }
 0x35c   : > { %1448 = vbcast.lane.b32.xlu0 %v1433_v32, 344  ;;  %1444 = vbcast.lane.b32.xlu1 %v1433_v32, 336  ;;  %v4129_v9 = vpop.permute.xlu1 %1222  ;;  %v1362_v32 = vmul.f32 %v4040_v23, %v4087_v55 }
 0x35e   : > { %v4121_v7 = vpop.permute.xlu0 %1206 }
 0x360   : > { %1460 = vbcast.lane.b32.xlu0 %v1453_v57, 328  ;;  %1456 = vbcast.lane.b32.xlu1 %v1453_v57, 320  ;;  %v4133_v12 = vpop.permute.xlu1 %1234 }
 0x362   : > { %v4127_v10 = vpop.permute.xlu0 %1218 }
 0x364   : > { %1468 = vbcast.lane.b32.xlu0 %v1453_v57, 344  ;;  %1464 = vbcast.lane.b32.xlu1 %v1453_v57, 336  ;;  %v4137_v15 = vpop.permute.xlu1 %1242 }
 0x366   : > { %v4131_v11 = vpop.permute.xlu0 %1226 }
 0x368   : > { %1480 = vbcast.lane.b32.xlu0 %v1473_v60, 328  ;;  %1476 = vbcast.lane.b32.xlu1 %v1473_v60, 320  ;;  %v4141_v13 = vpop.permute.xlu1 %1254 }
 0x36a   : > { %v4135_v14 = vpop.permute.xlu0 %1238 }
 0x36c   : > { %1488 = vbcast.lane.b32.xlu0 %v1473_v60, 344  ;;  %1484 = vbcast.lane.b32.xlu1 %v1473_v60, 336  ;;  %v4145_v18 = vpop.permute.xlu1 %1262 }
 0x36e   : > { %v4139_v16 = vpop.permute.xlu0 %1246 }
 0x370   : > { %1500 = vbcast.lane.b32.xlu0 %v1493_v1, 328  ;;  %1496 = vbcast.lane.b32.xlu1 %v1493_v1, 320  ;;  %v4149_v20 = vpop.permute.xlu1 %1646 }
 0x372   : > { %v4143_v17 = vpop.permute.xlu0 %1258 }
 0x374   : > { %1508 = vbcast.lane.b32.xlu0 %v1493_v1, 344  ;;  %1504 = vbcast.lane.b32.xlu1 %v1493_v1, 336  ;;  %v4153_v24 = vpop.permute.xlu1 %1650 }
 0x376   : > { %v4147_v19 = vpop.permute.xlu0 %1266 }
 0x378   : > { %1520 = vbcast.lane.b32.xlu0 %v1513_v4, 328  ;;  %1516 = vbcast.lane.b32.xlu1 %v1513_v4, 320  ;;  %v4157_v28 = vpop.permute.xlu1 %1654 }
 0x37a   : > { %v4151_v22 = vpop.permute.xlu0 %1648 }
 0x37c   : > { %1528 = vbcast.lane.b32.xlu0 %v1513_v4, 344  ;;  %1524 = vbcast.lane.b32.xlu1 %v1513_v4, 336  ;;  %v4161_v35 = vpop.permute.xlu1 %1658 }
 0x37e   : > { %v4155_v25 = vpop.permute.xlu0 %1652 }
 0x380   : > { %1540 = vbcast.lane.b32.xlu0 %v1533_v5, 328  ;;  %1536 = vbcast.lane.b32.xlu1 %v1533_v5, 320 }
 0x382   : > { %v4159_v31 = vpop.permute.xlu0 %1656 }
 0x384   : > { %1548 = vbcast.lane.b32.xlu0 %v1533_v5, 344  ;;  %1544 = vbcast.lane.b32.xlu1 %v1533_v5, 336 }
 0x386   : > { %v4163_v37 = vpop.permute.xlu0 %1660 }
 0x3ba   : > { %v1397_v45 = vpop.permute.xlu1 %1396  ;;  %v1401_v46 = vpop.permute.xlu0 %1400 }
 0x3bb   : > { %v1550_v48 = vsub.f32 %v1358_v43, %v1397_v45  ;;  %v1551_v49 = vsub.f32 %v1359_v44, %v1401_v46  ;;  %v1361_v43 = vmul.f32 %v4037_v21, %v4080_v50 }
 0x3bd   : > { %v1582_v57 = vmul.f32 1.442695, %v1550_v48  ;;  %v1584_v60 = vmul.f32 1.442695, %v1551_v49  ;;  %v1364_v49 = vmul.f32 %v4040_v23, %v4083_v53 }
 0x3be   : > { %v1417_v1 = vpop.permute.xlu1 %1416  ;;  %v1421_v4 = vpop.permute.xlu0 %1420 }
 0x3bf   : > { %3291 = vpow2.f32 %v1582_v57  ;;  %v1554_v5 = vsub.f32 %v1362_v32, %v1417_v1  ;;  %v1555_v40 = vsub.f32 %v1363_v52, %v1421_v4  ;;  %v1365_v52 = vmul.f32 %v4040_v23, %v4085_v54 }
 0x3c0   : > { %3293 = vpow2.f32 %v1584_v60  ;;  %v1366_v4 = vmul.f32 %v4045_v27, %v4091_v56 }
 0x3c1   : > { %v1590_v44 = vmul.f32 1.442695, %v1554_v5  ;;  %v1592_v45 = vmul.f32 1.442695, %v1555_v40  ;;  %v1367_v5 = vmul.f32 %v4045_v27, %v4093_v33  ;;  %v1368_v33 = vmul.f32 %v4045_v27, %v4097_v58 }
 0x3c2   : > { %v1405_v42 = vpop.permute.xlu1 %1404  ;;  %v1409_v46 = vpop.permute.xlu0 %1408 }
 0x3c3   : > { %3295 = vpow2.f32 %v1590_v44  ;;  %v1552_v55 = vsub.f32 %v1360_v41, %v1405_v42  ;;  %v1553_v48 = vsub.f32 %v1361_v43, %v1409_v46 }
 0x3c4   : > { %3297 = vpow2.f32 %v1592_v45  ;;  %v1369_v45 = vmul.f32 %v4045_v27, %v4099_v59  ;;  %v1370_v27 = vmul.f32 %v4048_v30, %v4103_v61  ;;  %v1371_v59 = vmul.f32 %v4048_v30, %v4105_v62 }
 0x3c5   : > { %v1586_v32 = vmul.f32 1.442695, %v1552_v55  ;;  %v1588_v57 = vmul.f32 1.442695, %v1553_v48  ;;  %v1372_v62 = vmul.f32 %v4048_v30, %v4107_v63 }
 0x3c6   : > { %v1425_v47 = vpop.permute.xlu1 %1424  ;;  %v1429_v60 = vpop.permute.xlu0 %1428 }
 0x3c7   : > { %3299 = vpow2.f32 %v1586_v32  ;;  %v1556_v21 = vsub.f32 %v1364_v49, %v1425_v47  ;;  %v1557_v50 = vsub.f32 %v1365_v52, %v1429_v60 }
 0x3c8   : > { %3301 = vpow2.f32 %v1588_v57 }
 0x3c9   : > { %v4181_v1 = vpop.eup %3291  ;;  %v1594_v53 = vmul.f32 1.442695, %v1556_v21  ;;  %v1596_v40 = vmul.f32 1.442695, %v1557_v50 }
 0x3ca   : > { %v4187_v41 = vpop.eup %3293  ;;  %1991 = vrot.lane.b32.xlu1 %v4181_v1, %s3640_s26  ;;  %v1437_v23 = vpop.permute.xlu1 %1436 }
 0x3cb   : > { %v1441_v54 = vpop.permute.xlu0 %1440  ;;  %3303 = vpow2.f32 %v1594_v53  ;;  %v1558_v43 = vsub.f32 %v1366_v4, %v1437_v23  ;;  %1993 = vrot.lane.b32.xlu0 %v4187_v41, %s3640_s26  ;;  %v1373_v53 = vmul.f32 %v4048_v30, %v4109_v0  ;;  %v1374_v30 = vmul.f32 %v4053_v34, %v4113_v2 }
 0x3cc   : > { %v1559_v44 = vsub.f32 %v1367_v5, %v1441_v54  ;;  %3305 = vpow2.f32 %v1596_v40  ;;  %v1375_v0 = vmul.f32 %v4053_v34, %v4115_v3  ;;  %v1376_v3 = vmul.f32 %v4053_v34, %v4119_v6 }
 0x3cd   : > { %v4193_v56 = vpop.eup %3295  ;;  %v1598_v42 = vmul.f32 1.442695, %v1558_v43 }
 0x3ce   : > { %v1600_v46 = vmul.f32 1.442695, %v1559_v44  ;;  %v4199_v55 = vpop.eup %3297  ;;  %v1445_v48 = vpop.permute.xlu1 %1444  ;;  %1999 = vrot.lane.b32.xlu1 %v4193_v56, %s3640_s26 }
 0x3cf   : > { %v1449_v49 = vpop.permute.xlu0 %1448  ;;  %3307 = vpow2.f32 %v1598_v42  ;;  %v1560_v52 = vsub.f32 %v1368_v33, %v1445_v48  ;;  %2001 = vrot.lane.b32.xlu0 %v4199_v55, %s3640_s26 }
 0x3d0   : > { %v1561_v32 = vsub.f32 %v1369_v45, %v1449_v49  ;;  %3309 = vpow2.f32 %v1600_v46 }
 0x3d1   : > { %v4205_v58 = vpop.eup %3299  ;;  %v1602_v57 = vmul.f32 1.442695, %v1560_v52 }
 0x3d2   : > { %v1604_v47 = vmul.f32 1.442695, %v1561_v32  ;;  %v4211_v60 = vpop.eup %3301  ;;  %v1457_v21 = vpop.permute.xlu1 %1456  ;;  %1995 = vrot.lane.b32.xlu1 %v4205_v58, %s3640_s26 }
 0x3d3   : > { %v1461_v50 = vpop.permute.xlu0 %1460  ;;  %3311 = vpow2.f32 %v1602_v57  ;;  %v1562_v4 = vsub.f32 %v1370_v27, %v1457_v21  ;;  %1997 = vrot.lane.b32.xlu0 %v4211_v60, %s3640_s26 }
 0x3d4   : > { %v1563_v5 = vsub.f32 %v1371_v59, %v1461_v50  ;;  %3313 = vpow2.f32 %v1604_v47  ;;  %v1377_v59 = vmul.f32 %v4053_v34, %v4121_v7  ;;  %v1378_v34 = vmul.f32 %v4056_v36, %v4125_v8 }
 0x3d5   : > { %v4217_v61 = vpop.eup %3303  ;;  %v1606_v40 = vmul.f32 1.442695, %v1562_v4  ;;  %v1379_v7 = vmul.f32 %v4056_v36, %v4127_v10  ;;  %v1380_v10 = vmul.f32 %v4056_v36, %v4129_v9 }
 0x3d6   : > { %v1608_v23 = vmul.f32 1.442695, %v1563_v5  ;;  %v4223_v54 = vpop.eup %3305  ;;  %v1465_v43 = vpop.permute.xlu1 %1464  ;;  %2003 = vrot.lane.b32.xlu1 %v4217_v61, %s3640_s26 }
 0x3d7   : > { %v1469_v44 = vpop.permute.xlu0 %1468  ;;  %3315 = vpow2.f32 %v1606_v40  ;;  %v1564_v33 = vsub.f32 %v1372_v62, %v1465_v43  ;;  %2005 = vrot.lane.b32.xlu0 %v4223_v54, %s3640_s26 }
 0x3d8   : > { %v1565_v45 = vsub.f32 %v1373_v53, %v1469_v44  ;;  %3317 = vpow2.f32 %v1608_v23 }
 0x3d9   : > { %v4229_v63 = vpop.eup %3307  ;;  %v1610_v42 = vmul.f32 1.442695, %v1564_v33 }
 0x3da   : > { %v1612_v46 = vmul.f32 1.442695, %v1565_v45  ;;  %v4235_v48 = vpop.eup %3309  ;;  %v1477_v49 = vpop.permute.xlu1 %1476  ;;  %2007 = vrot.lane.b32.xlu1 %v4229_v63, %s3640_s26 }
 0x3db   : > { %v1481_v52 = vpop.permute.xlu0 %1480  ;;  %3319 = vpow2.f32 %v1610_v42  ;;  %v1566_v32 = vsub.f32 %v1374_v30, %v1477_v49  ;;  %2009 = vrot.lane.b32.xlu0 %v4235_v48, %s3640_s26  ;;  %v1381_v30 = vmul.f32 %v4056_v36, %v4131_v11  ;;  %v1382_v36 = vmul.f32 %v4061_v38, %v4133_v12 }
 0x3dc   : > { %v1567_v27 = vsub.f32 %v1375_v0, %v1481_v52  ;;  %3321 = vpow2.f32 %v1612_v46  ;;  %v1383_v11 = vmul.f32 %v4061_v38, %v4135_v14  ;;  %v1384_v14 = vmul.f32 %v4061_v38, %v4137_v15 }
 0x3dd   : > { %v4241_v2 = vpop.eup %3311  ;;  %v1614_v57 = vmul.f32 1.442695, %v1566_v32 }
 0x3de   : > { %v1616_v47 = vmul.f32 1.442695, %v1567_v27  ;;  %v4247_v21 = vpop.eup %3313  ;;  %v1485_v50 = vpop.permute.xlu1 %1484  ;;  %2011 = vrot.lane.b32.xlu1 %v4241_v2, %s3640_s26 }
 0x3df   : > { %v1489_v4 = vpop.permute.xlu0 %1488  ;;  %3323 = vpow2.f32 %v1614_v57  ;;  %v1568_v5 = vsub.f32 %v1376_v3, %v1485_v50  ;;  %2013 = vrot.lane.b32.xlu0 %v4247_v21, %s3640_s26 }
 0x3e0   : > { %v1569_v62 = vsub.f32 %v1377_v59, %v1489_v4  ;;  %3325 = vpow2.f32 %v1616_v47 }
 0x3e1   : > { %v4253_v6 = vpop.eup %3315  ;;  %v1618_v53 = vmul.f32 1.442695, %v1568_v5 }
 0x3e2   : > { %v1620_v40 = vmul.f32 1.442695, %v1569_v62  ;;  %v4259_v23 = vpop.eup %3317  ;;  %v1497_v43 = vpop.permute.xlu1 %1496  ;;  %2015 = vrot.lane.b32.xlu1 %v4253_v6, %s3640_s26  ;;  %v1385_v62 = vmul.f32 %v4061_v38, %v4139_v16  ;;  %v1386_v38 = vmul.f32 %v4064_v39, %v4141_v13  ;;  %v1387_v16 = vmul.f32 %v4064_v39, %v4143_v17 }
 0x3e3   : > { %v1501_v44 = vpop.permute.xlu0 %1500  ;;  %3327 = vpow2.f32 %v1618_v53  ;;  %v1570_v33 = vsub.f32 %v1378_v34, %v1497_v43  ;;  %2017 = vrot.lane.b32.xlu0 %v4259_v23, %s3640_s26  ;;  %v1388_v17 = vmul.f32 %v4064_v39, %v4145_v18 }
 0x3e4   : > { %v1571_v45 = vsub.f32 %v1379_v7, %v1501_v44  ;;  %3329 = vpow2.f32 %v1620_v40 }
 0x3e5   : > { %v4265_v8 = vpop.eup %3319  ;;  %v1622_v0 = vmul.f32 1.442695, %v1570_v33 }
 0x3e6   : > { %v1624_v42 = vmul.f32 1.442695, %v1571_v45  ;;  %v4271_v46 = vpop.eup %3321  ;;  %v1505_v49 = vpop.permute.xlu1 %1504  ;;  %2019 = vrot.lane.b32.xlu1 %v4265_v8, %s3640_s26 }
 0x3e7   : > { %v1509_v52 = vpop.permute.xlu0 %1508  ;;  %3331 = vpow2.f32 %v1622_v0  ;;  %v1572_v32 = vsub.f32 %v1380_v10, %v1505_v49  ;;  %2021 = vrot.lane.b32.xlu0 %v4271_v46, %s3640_s26 }
 0x3e8   : > { %v1573_v27 = vsub.f32 %v1381_v30, %v1509_v52  ;;  %3333 = vpow2.f32 %v1624_v42 }
 0x3e9   : > { %v4277_v9 = vpop.eup %3323  ;;  %v1626_v3 = vmul.f32 1.442695, %v1572_v32  ;;  %v1389_v32 = vmul.f32 %v4064_v39, %v4147_v19 }
 0x3ea   : > { %v1628_v59 = vmul.f32 1.442695, %v1573_v27  ;;  %v4283_v57 = vpop.eup %3325  ;;  %v1517_v47 = vpop.permute.xlu1 %1516  ;;  %2023 = vrot.lane.b32.xlu1 %v4277_v9, %s3640_s26 }
 0x3eb   : > { %v1521_v50 = vpop.permute.xlu0 %1520  ;;  %3335 = vpow2.f32 %v1626_v3  ;;  %v1574_v4 = vsub.f32 %v1382_v36, %v1517_v47  ;;  %2025 = vrot.lane.b32.xlu0 %v4283_v57, %s3640_s26 }
 0x3ec   : > { %v1575_v5 = vsub.f32 %v1383_v11, %v1521_v50  ;;  %3337 = vpow2.f32 %v1628_v59 }
 0x3ed   : > { %v4289_v12 = vpop.eup %3327  ;;  %v1630_v34 = vmul.f32 1.442695, %v1574_v4 }
 0x3ee   : > { %v1632_v7 = vmul.f32 1.442695, %v1575_v5  ;;  %v4295_v53 = vpop.eup %3329  ;;  %v1525_v40 = vpop.permute.xlu1 %1524  ;;  %2027 = vrot.lane.b32.xlu1 %v4289_v12, %s3640_s26 }
 0x3ef   : > { %v1529_v43 = vpop.permute.xlu0 %1528  ;;  %3339 = vpow2.f32 %v1630_v34  ;;  %v1576_v44 = vsub.f32 %v1384_v14, %v1525_v40  ;;  %2029 = vrot.lane.b32.xlu0 %v4295_v53, %s3640_s26 }
 0x3f0   : > { %v1577_v33 = vsub.f32 %v1385_v62, %v1529_v43  ;;  %3341 = vpow2.f32 %v1632_v7  ;;  %v1670_v43 = vmul.f32 %v4181_v1, %v4149_v20  ;;  %v1672_v1 = vmul.f32 %v4205_v58, %v4149_v20 }
 0x3f1   : > { %v4301_v15 = vpop.eup %3331  ;;  %v1634_v45 = vmul.f32 1.442695, %v1576_v44  ;;  %v1671_v44 = vmul.f32 %v4187_v41, %v4149_v20  ;;  %v1673_v41 = vmul.f32 %v4211_v60, %v4149_v20  ;;  %v1678_v58 = vmul.f32 %v4229_v63, %v4153_v24 }
 0x3f2   : > { %v1636_v10 = vmul.f32 1.442695, %v1577_v33  ;;  %v4307_v30 = vpop.eup %3333  ;;  %v1537_v0 = vpop.permute.xlu1 %1536  ;;  %2031 = vrot.lane.b32.xlu1 %v4301_v15, %s3640_s26  ;;  %v1674_v33 = vmul.f32 %v4193_v56, %v4151_v22  ;;  %v1676_v56 = vmul.f32 %v4217_v61, %v4151_v22  ;;  %v1679_v20 = vmul.f32 %v4235_v48, %v4153_v24 }
 0x3f3   : > { %v1541_v42 = vpop.permute.xlu0 %1540  ;;  %3343 = vpow2.f32 %v1634_v45  ;;  %v1578_v49 = vsub.f32 %v1386_v38, %v1537_v0  ;;  %2033 = vrot.lane.b32.xlu0 %v4307_v30, %s3640_s26  ;;  %v1675_v38 = vmul.f32 %v4199_v55, %v4151_v22  ;;  %v1677_v55 = vmul.f32 %v4223_v54, %v4151_v22 }
 0x3f4   : > { %v1579_v52 = vsub.f32 %v1387_v16, %v1541_v42  ;;  %3345 = vpow2.f32 %v1636_v10  ;;  %v1680_v60 = vmul.f32 %v4241_v2, %v4153_v24  ;;  %v1681_v22 = vmul.f32 %v4247_v21, %v4153_v24 }
 0x3f5   : > { %v4313_v13 = vpop.eup %3335  ;;  %v1638_v27 = vmul.f32 1.442695, %v1578_v49  ;;  %v1682_v61 = vmul.f32 %v4253_v6, %v4155_v25  ;;  %v1683_v54 = vmul.f32 %v4259_v23, %v4155_v25  ;;  %v1684_v63 = vmul.f32 %v4265_v8, %v4155_v25 }
 0x3f6   : > { %v1640_v36 = vmul.f32 1.442695, %v1579_v52  ;;  %v4319_v11 = vpop.eup %3337  ;;  %v1545_v3 = vpop.permute.xlu1 %1544  ;;  %2035 = vrot.lane.b32.xlu1 %v4313_v13, %s3640_s26  ;;  %v1685_v24 = vmul.f32 %v4271_v46, %v4155_v25  ;;  %v1686_v48 = vmul.f32 %v4277_v9, %v4157_v28  ;;  %v1687_v2 = vmul.f32 %v4283_v57, %v4157_v28 }
 0x3f7   : > { %v1549_v59 = vpop.permute.xlu0 %1548  ;;  %3347 = vpow2.f32 %v1638_v27  ;;  %v1580_v47 = vsub.f32 %v1388_v17, %v1545_v3  ;;  %2037 = vrot.lane.b32.xlu0 %v4319_v11, %s3640_s26  ;;  %v1688_v21 = vmul.f32 %v4289_v12, %v4157_v28  ;;  %v1689_v25 = vmul.f32 %v4295_v53, %v4157_v28 }
 0x3f8   : > { %v1581_v50 = vsub.f32 %v1389_v32, %v1549_v59  ;;  %3349 = vpow2.f32 %v1640_v36  ;;  %v1690_v6 = vmul.f32 %v4301_v15, %v4159_v31  ;;  %v1691_v23 = vmul.f32 %v4307_v30, %v4159_v31 }
 0x3f9   : > { %v4325_v18 = vpop.eup %3339  ;;  %v1642_v4 = vmul.f32 1.442695, %v1580_v47  ;;  %v1692_v8 = vmul.f32 %v4313_v13, %v4159_v31  ;;  %v1693_v28 = vmul.f32 %v4319_v11, %v4159_v31 }
 0x3fa   : > { %v1644_v39 = vmul.f32 1.442695, %v1581_v50  ;;  %v4327_v19 = vpop.eup %3341  ;;  %2039 = vrot.lane.b32.xlu1 %v4325_v18, %s3640_s26  ;;  %v1694_v46 = vmul.f32 %v4325_v18, %v4161_v35 }
 0x3fb   : > { %3351 = vpow2.f32 %v1642_v4  ;;  %2041 = vrot.lane.b32.xlu0 %v4327_v19, %s3640_s26  ;;  %v1695_v9 = vmul.f32 %v4327_v19, %v4161_v35 }
 0x3fc   : > { %3353 = vpow2.f32 %v1644_v39 }
 0x3fd   : > { %v4333_v5 = vpop.eup %3343 }
 0x3fe   : > { %v4335_v14 = vpop.eup %3345  ;;  %2043 = vrot.lane.b32.xlu1 %v4333_v5, %s3640_s26  ;;  %v1696_v12 = vmul.f32 %v4333_v5, %v4161_v35 }
 0x3ff   : > { %2045 = vrot.lane.b32.xlu0 %v4335_v14, %s3640_s26  ;;  %v1697_v31 = vmul.f32 %v4335_v14, %v4161_v35 }
 0x401   : > { %v4341_v62 = vpop.eup %3347 }
 0x402   : > { %v4343_v34 = vpop.eup %3349  ;;  %2047 = vrot.lane.b32.xlu1 %v4341_v62, %s3640_s26  ;;  %v1698_v16 = vmul.f32 %v4341_v62, %v4163_v37 }
 0x403   : > { %2049 = vrot.lane.b32.xlu0 %v4343_v34, %s3640_s26  ;;  %v1699_v10 = vmul.f32 %v4343_v34, %v4163_v37 }
 0x405   : > { %v4349_v7 = vpop.eup %3351 }
 0x406   : > { %v4351_v40 = vpop.eup %3353  ;;  %2051 = vrot.lane.b32.xlu1 %v4349_v7, %s3640_s26  ;;  %v1700_v35 = vmul.f32 %v4349_v7, %v4163_v37 }
 0x407   : > { %2053 = vrot.lane.b32.xlu0 %v4351_v40, %s3640_s26  ;;  %v1701_v42 = vmul.f32 %v4351_v40, %v4163_v37 }
 0x40a   : > { %1734 = vrot.lane.b32.xlu1 %v1670_v43, %s3640_s26 }
 0x40b   : > { %1736 = vrot.lane.b32.xlu0 %v1671_v44, %s3640_s26 }
 0x40e   : > { %1742 = vrot.lane.b32.xlu1 %v1674_v33, %s3640_s26 }
 0x40f   : > { %1744 = vrot.lane.b32.xlu0 %v1675_v38, %s3640_s26 }
 0x412   : > { %1738 = vrot.lane.b32.xlu1 %v1672_v1, %s3640_s26 }
 0x413   : > { %1740 = vrot.lane.b32.xlu0 %v1673_v41, %s3640_s26 }
 0x416   : > { %1746 = vrot.lane.b32.xlu1 %v1676_v56, %s3640_s26 }
 0x417   : > { %1748 = vrot.lane.b32.xlu0 %v1677_v55, %s3640_s26 }
 0x41a   : > { %1750 = vrot.lane.b32.xlu1 %v1678_v58, %s3640_s26 }
 0x41b   : > { %1752 = vrot.lane.b32.xlu0 %v1679_v20, %s3640_s26 }
 0x41e   : > { %1754 = vrot.lane.b32.xlu1 %v1680_v60, %s3640_s26 }
 0x41f   : > { %1756 = vrot.lane.b32.xlu0 %v1681_v22, %s3640_s26 }
 0x422   : > { %1758 = vrot.lane.b32.xlu1 %v1682_v61, %s3640_s26 }
 0x423   : > { %1760 = vrot.lane.b32.xlu0 %v1683_v54, %s3640_s26 }
 0x426   : > { %1762 = vrot.lane.b32.xlu1 %v1684_v63, %s3640_s26 }
 0x427   : > { %1764 = vrot.lane.b32.xlu0 %v1685_v24, %s3640_s26 }
 0x42a   : > { %1766 = vrot.lane.b32.xlu1 %v1686_v48, %s3640_s26 }
 0x42b   : > { %1768 = vrot.lane.b32.xlu0 %v1687_v2, %s3640_s26 }
 0x42e   : > { %1770 = vrot.lane.b32.xlu1 %v1688_v21, %s3640_s26 }
 0x42f   : > { %1772 = vrot.lane.b32.xlu0 %v1689_v25, %s3640_s26 }
 0x432   : > { %1774 = vrot.lane.b32.xlu1 %v1690_v6, %s3640_s26 }
 0x433   : > { %1776 = vrot.lane.b32.xlu0 %v1691_v23, %s3640_s26 }
 0x436   : > { %1778 = vrot.lane.b32.xlu1 %v1692_v8, %s3640_s26 }
 0x437   : > { %1780 = vrot.lane.b32.xlu0 %v1693_v28, %s3640_s26 }
 0x43a   : > { %1782 = vrot.lane.b32.xlu1 %v1694_v46, %s3640_s26 }
 0x43b   : > { %1784 = vrot.lane.b32.xlu0 %v1695_v9, %s3640_s26 }
 0x43c   : > { %v1992_v57 = vpop.permute.xlu1 %1991 }
 0x43d   : > { %v1994_v53 = vpop.permute.xlu0 %1993  ;;  %v2087_v62 = vsel %vm1830_vm2, %v1992_v57, 0.0 }
 0x43e   : > { %1786 = vrot.lane.b32.xlu1 %v1696_v12, %s3640_s26  ;;  %v2090_v19 = vsel %vm1830_vm2, %v1994_v53, 0.0 }
 0x43f   : > { %1788 = vrot.lane.b32.xlu0 %v1697_v31, %s3640_s26 }
 0x440   : > { %v2000_v15 = vpop.permute.xlu1 %1999 }
 0x441   : > { %v2002_v45 = vpop.permute.xlu0 %2001  ;;  %v2099_v14 = vsel %vm1830_vm2, %v2000_v15, 0.0 }
 0x442   : > { %1790 = vrot.lane.b32.xlu1 %v1698_v16, %s3640_s26  ;;  %v2102_v43 = vsel %vm1830_vm2, %v2002_v45, 0.0 }
 0x443   : > { %1792 = vrot.lane.b32.xlu0 %v1699_v10, %s3640_s26 }
 0x444   : > { %v1996_v30 = vpop.permute.xlu1 %1995 }
 0x445   : > { %v1998_v0 = vpop.permute.xlu0 %1997  ;;  %v2093_v40 = vsel %vm1830_vm2, %v1996_v30, 0.0 }
 0x446   : > { %1794 = vrot.lane.b32.xlu1 %v1700_v35, %s3640_s26  ;;  %v2096_v38 = vsel %vm1830_vm2, %v1998_v0, 0.0 }
 0x447   : > { %1796 = vrot.lane.b32.xlu0 %v1701_v42, %s3640_s26 }
 0x448   : > { %v2004_v49 = vpop.permute.xlu1 %2003 }
 0x449   : > { %v2006_v52 = vpop.permute.xlu0 %2005  ;;  %v2105_v33 = vsel %vm1830_vm2, %v2004_v49, 0.0 }
 0x44a   : > { %v2108_v56 = vsel %vm1830_vm2, %v2006_v52, 0.0 }
 0x44c   : > { %v2008_v13 = vpop.permute.xlu1 %2007 }
 0x44d   : > { %v2010_v17 = vpop.permute.xlu0 %2009  ;;  %v2111_v41 = vsel %vm1830_vm2, %v2008_v13, 0.0 }
 0x44e   : > { %v2114_v60 = vsel %vm1830_vm2, %v2010_v17, 0.0 }
 0x450   : > { %v2012_v32 = vpop.permute.xlu1 %2011 }
 0x451   : > { %v2014_v27 = vpop.permute.xlu0 %2013  ;;  %v2117_v20 = vsel %vm1830_vm2, %v2012_v32, 0.0 }
 0x452   : > { %v2120_v54 = vsel %vm1830_vm2, %v2014_v27, 0.0 }
 0x454   : > { %v2016_v36 = vpop.permute.xlu1 %2015 }
 0x455   : > { %v2018_v11 = vpop.permute.xlu0 %2017  ;;  %v2123_v61 = vsel %vm1830_vm2, %v2016_v36, 0.0 }
 0x456   : > { %v2126_v48 = vsel %vm1830_vm2, %v2018_v11, 0.0 }
 0x458   : > { %v2020_v3 = vpop.permute.xlu1 %2019 }
 0x459   : > { %v2022_v59 = vpop.permute.xlu0 %2021  ;;  %v2129_v24 = vsel %vm1830_vm2, %v2020_v3, 0.0 }
 0x45a   : > { %v2132_v6 = vsel %vm1830_vm2, %v2022_v59, 0.0 }
 0x45c   : > { %v2024_v47 = vpop.permute.xlu1 %2023 }
 0x45d   : > { %v2026_v50 = vpop.permute.xlu0 %2025  ;;  %v2135_v25 = vsel %vm1830_vm2, %v2024_v47, 0.0 }
 0x45e   : > { %v2138_v28 = vsel %vm1830_vm2, %v2026_v50, 0.0 }
 0x460   : > { %v2028_v18 = vpop.permute.xlu1 %2027 }
 0x461   : > { %v2030_v4 = vpop.permute.xlu0 %2029  ;;  %v2141_v8 = vsel %vm1830_vm2, %v2028_v18, 0.0 }
 0x462   : > { %v2144_v57 = vsel %vm1830_vm2, %v2030_v4, 0.0 }
 0x464   : > { %v2032_v37 = vpop.permute.xlu1 %2031 }
 0x465   : > { %v2034_v39 = vpop.permute.xlu0 %2033  ;;  %v2147_v9 = vsel %vm1830_vm2, %v2032_v37, 0.0 }
 0x466   : > { %2091 = vadd.xlane.f32.xlu0 %v2090_v19  ;;  %v2150_v15 = vsel %vm1830_vm2, %v2034_v39, 0.0 }
 0x468   : > { %v2036_v5 = vpop.permute.xlu1 %2035 }
 0x469   : > { %v2038_v34 = vpop.permute.xlu0 %2037  ;;  %v2153_v31 = vsel %vm1830_vm2, %v2036_v5, 0.0 }
 0x46a   : > { %2100 = vadd.xlane.f32.xlu0 %v2099_v14  ;;  %2088 = vadd.xlane.f32.xlu1 %v2087_v62  ;;  %v2156_v10 = vsel %vm1830_vm2, %v2038_v34, 0.0 }
 0x46c   : > { %v2040_v7 = vpop.permute.xlu1 %2039 }
 0x46d   : > { %v2042_v44 = vpop.permute.xlu0 %2041  ;;  %v2159_v45 = vsel %vm1830_vm2, %v2040_v7, 0.0 }
 0x46e   : > { %2094 = vadd.xlane.f32.xlu0 %v2093_v40  ;;  %2103 = vadd.xlane.f32.xlu1 %v2102_v43  ;;  %v2162_v0 = vsel %vm1830_vm2, %v2042_v44, 0.0 }
 0x470   : > { %v2044_v1 = vpop.permute.xlu1 %2043 }
 0x471   : > { %v2046_v55 = vpop.permute.xlu0 %2045  ;;  %v2165_v35 = vsel %vm1830_vm2, %v2044_v1, 0.0 }
 0x472   : > { %2106 = vadd.xlane.f32.xlu0 %v2105_v33  ;;  %2097 = vadd.xlane.f32.xlu1 %v2096_v38  ;;  %v2168_v13 = vsel %vm1830_vm2, %v2046_v55, 0.0 }
 0x474   : > { %v2048_v58 = vpop.permute.xlu1 %2047 }
 0x475   : > { %v2050_v22 = vpop.permute.xlu0 %2049  ;;  %v2171_v52 = vsel %vm1830_vm2, %v2048_v58, 0.0 }
 0x476   : > { %2112 = vadd.xlane.f32.xlu0 %v2111_v41  ;;  %2109 = vadd.xlane.f32.xlu1 %v2108_v56  ;;  %v2174_v27 = vsel %vm1830_vm2, %v2050_v22, 0.0 }
 0x478   : > { %v2052_v63 = vpop.permute.xlu1 %2051 }
 0x479   : > { %v2054_v2 = vpop.permute.xlu0 %2053  ;;  %v2177_v32 = vsel %vm1830_vm2, %v2052_v63, 0.0 }
 0x47a   : > { %2118 = vadd.xlane.f32.xlu0 %v2117_v20  ;;  %2115 = vadd.xlane.f32.xlu1 %v2114_v60  ;;  %v2180_v11 = vsel %vm1830_vm2, %v2054_v2, 0.0 }
 0x47c   : > { %v1735_v21 = vpop.permute.xlu1 %1734 }
 0x47d   : > { %v1737_v23 = vpop.permute.xlu0 %1736  ;;  %v1831_v3 = vsel %vm1830_vm2, %v1735_v21, 0.0 }
 0x47e   : > { %2124 = vadd.xlane.f32.xlu0 %v2123_v61  ;;  %2121 = vadd.xlane.f32.xlu1 %v2120_v54  ;;  %v1834_v50 = vsel %vm1830_vm2, %v1737_v23, 0.0 }
 0x480   : > { %v1743_v46 = vpop.permute.xlu1 %1742 }
 0x481   : > { %v1745_v12 = vpop.permute.xlu0 %1744  ;;  %v1843_v18 = vsel %vm1830_vm2, %v1743_v46, 0.0 }
 0x482   : > { %2130 = vadd.xlane.f32.xlu0 %v2129_v24  ;;  %2127 = vadd.xlane.f32.xlu1 %v2126_v48  ;;  %v1846_v37 = vsel %vm1830_vm2, %v1745_v12, 0.0 }
 0x484   : > { %v1739_v53 = vpop.permute.xlu1 %1738 }
 0x485   : > { %v1741_v16 = vpop.permute.xlu0 %1740  ;;  %v1837_v39 = vsel %vm1830_vm2, %v1739_v53, 0.0 }
 0x486   : > { %2136 = vadd.xlane.f32.xlu0 %v2135_v25  ;;  %2133 = vadd.xlane.f32.xlu1 %v2132_v6  ;;  %v1840_v5 = vsel %vm1830_vm2, %v1741_v16, 0.0  ;;  %v3270_v16 = vld [vmem:[#allocation9] sm:$0xff]  }
 0x488   : > { %v1747_v30 = vpop.permute.xlu1 %1746 }
 0x489   : > { %v1749_v42 = vpop.permute.xlu0 %1748  ;;  %v1849_v14 = vsel %vm1830_vm2, %v1747_v30, 0.0 }
 0x48a   : > { %2142 = vadd.xlane.f32.xlu0 %v2141_v8  ;;  %2139 = vadd.xlane.f32.xlu1 %v2138_v28  ;;  %v1852_v7 = vsel %vm1830_vm2, %v1749_v42, 0.0  ;;  %v3272_v42 = vld [vmem:[#allocation9 + $0x8] sm:$0xff]  }
 0x48c   : > { %v1751_v49 = vpop.permute.xlu1 %1750 }
 0x48d   : > { %v1753_v17 = vpop.permute.xlu0 %1752  ;;  %v1855_v40 = vsel %vm1830_vm2, %v1751_v49, 0.0 }
 0x48e   : > { %2148 = vadd.xlane.f32.xlu0 %v2147_v9  ;;  %2145 = vadd.xlane.f32.xlu1 %v2144_v57  ;;  %v1858_v44 = vsel %vm1830_vm2, %v1753_v17, 0.0  ;;  %v3273_v17 = vld [vmem:[#allocation9 + $0x50] sm:$0xff]  }
 0x490   : > { %v1755_v36 = vpop.permute.xlu1 %1754 }
 0x491   : > { %v1757_v59 = vpop.permute.xlu0 %1756  ;;  %v1861_v33 = vsel %vm1830_vm2, %v1755_v36, 0.0  ;;  %v3275_v36 = vld [vmem:[#allocation9 + $0x58] sm:$0xff]  }
 0x492   : > { %2154 = vadd.xlane.f32.xlu0 %v2153_v31  ;;  %2151 = vadd.xlane.f32.xlu1 %v2150_v15  ;;  %v1864_v1 = vsel %vm1830_vm2, %v1757_v59, 0.0  ;;  %v3269_v15 = vld [vmem:[#allocation9 + $0x40] sm:$0xff]  }
 0x493   : > { %3022 = vmatprep.subr.bf16.mxu1 %v3269_v15  ;;  %v3278_v59 = vld [vmem:[#allocation9 + $0x20] sm:$0xff]  }
 0x494   : > { %v1759_v47 = vpop.permute.xlu1 %1758  ;;  %3023 = vmatpush3.bf16.msra.mxu1 %v3270_v16 }
 0x495   : > { %v1761_v4 = vpop.permute.xlu0 %1760  ;;  %v1867_v41 = vsel %vm1830_vm2, %v1759_v47, 0.0  ;;  %v3279_v47 = vld [vmem:[#allocation9 + $0x68] sm:$0xff]  }
 0x496   : > { %2160 = vadd.xlane.f32.xlu0 %v2159_v45  ;;  %2157 = vadd.xlane.f32.xlu1 %v2156_v10  ;;  %v1870_v58 = vsel %vm1830_vm2, %v1761_v4, 0.0 }
 0x498   : > { %v1763_v19 = vpop.permute.xlu1 %1762 }
 0x499   : > { %v1765_v62 = vpop.permute.xlu0 %1764  ;;  %v1873_v20 = vsel %vm1830_vm2, %v1763_v19, 0.0 }
 0x49a   : > { %2166 = vadd.xlane.f32.xlu0 %v2165_v35  ;;  %2163 = vadd.xlane.f32.xlu1 %v2162_v0  ;;  %v1876_v22 = vsel %vm1830_vm2, %v1765_v62, 0.0  ;;  %v3271_v0 = vld [vmem:[#allocation9 + $0x48] sm:$0xff]  }
 0x49b   : > { %3024 = vmatprep.subr.bf16.mxu1 %v3271_v0 }
 0x49c   : > { %v1767_v34 = vpop.permute.xlu1 %1766  ;;  %3025 = vmatpush3.bf16.msra.mxu1 %v3272_v42 }
 0x49d   : > { %v1769_v43 = vpop.permute.xlu0 %1768  ;;  %v1879_v61 = vsel %vm1830_vm2, %v1767_v34, 0.0  ;;  %3026 = vmatprep.subr.bf16.mxu1 %v3273_v17 }
 0x49e   : > { %2172 = vadd.xlane.f32.xlu0 %v2171_v52  ;;  %2169 = vadd.xlane.f32.xlu1 %v2168_v13  ;;  %v1882_v63 = vsel %vm1830_vm2, %v1769_v43, 0.0  ;;  %v3286_v43 = vld [vmem:[%s4706_s7 + $0x8] sm:$0xff]  }
 0x4a0   : > { %v1771_v38 = vpop.permute.xlu1 %1770 }
 0x4a1   : > { %v1773_v56 = vpop.permute.xlu0 %1772  ;;  %v1885_v24 = vsel %vm1830_vm2, %v1771_v38, 0.0 }
 0x4a2   : > { %2178 = vadd.xlane.f32.xlu0 %v2177_v32  ;;  %2175 = vadd.xlane.f32.xlu1 %v2174_v27  ;;  %v1888_v21 = vsel %vm1830_vm2, %v1773_v56, 0.0  ;;  %v3274_v32 = vld [vmem:[#allocation9 + $0x10] sm:$0xff]  }
 0x4a3   : > { %3027 = vmatpush3.bf16.msra.mxu1 %v3274_v32 }
 0x4a4   : > { %v1775_v55 = vpop.permute.xlu1 %1774  ;;  %3028 = vmatprep.subr.bf16.mxu1 %v3275_v36 }
 0x4a5   : > { %v1777_v60 = vpop.permute.xlu0 %1776  ;;  %v1891_v25 = vsel %vm1830_vm2, %v1775_v55, 0.0 }
 0x4a6   : > { %1832 = vadd.xlane.f32.xlu0 %v1831_v3  ;;  %2181 = vadd.xlane.f32.xlu1 %v2180_v11  ;;  %v1894_v23 = vsel %vm1830_vm2, %v1777_v60, 0.0  ;;  %v3276_v11 = vld [vmem:[#allocation9 + $0x18] sm:$0xff]   ;;  %v3277_v3 = vld [vmem:[#allocation9 + $0x60] sm:$0xff]  }
 0x4a7   : > { %3029 = vmatpush3.bf16.msra.mxu1 %v3276_v11 }
 0x4a8   : > { %v1779_v54 = vpop.permute.xlu1 %1778  ;;  %3030 = vmatprep.subr.bf16.mxu1 %v3277_v3 }
 0x4a9   : > { %v1781_v48 = vpop.permute.xlu0 %1780  ;;  %v1897_v8 = vsel %vm1830_vm2, %v1779_v54, 0.0 }
 0x4aa   : > { %1844 = vadd.xlane.f32.xlu0 %v1843_v18  ;;  %1835 = vadd.xlane.f32.xlu1 %v1834_v50  ;;  %v1900_v46 = vsel %vm1830_vm2, %v1781_v48, 0.0  ;;  %v3280_v50 = vld [vmem:[#allocation9 + $0x28] sm:$0xff]   ;;  %v3281_v18 = vld [vmem:[#allocation9 + $0x70] sm:$0xff]  }
 0x4ab   : > { %3031 = vmatpush3.bf16.msra.mxu1 %v3278_v59 }
 0x4ac   : > { %v1783_v2 = vpop.permute.xlu1 %1782  ;;  %3032 = vmatprep.subr.bf16.mxu1 %v3279_v47 }
 0x4ad   : > { %v1785_v6 = vpop.permute.xlu0 %1784  ;;  %v1903_v9 = vsel %vm1830_vm2, %v1783_v2, 0.0 }
 0x4ae   : > { %1838 = vadd.xlane.f32.xlu0 %v1837_v39  ;;  %1847 = vadd.xlane.f32.xlu1 %v1846_v37  ;;  %v1906_v53 = vsel %vm1830_vm2, %v1785_v6, 0.0  ;;  %v3282_v37 = vld [vmem:[#allocation9 + $0x30] sm:$0xff]   ;;  %v3283_v39 = vld [vmem:[#allocation9 + $0x78] sm:$0xff]  }
 0x4af   : > { %3033 = vmatpush3.bf16.msra.mxu1 %v3280_v50 }
 0x4b0   : > { %v1787_v28 = vpop.permute.xlu1 %1786  ;;  %3034 = vmatprep.subr.bf16.mxu1 %v3281_v18 }
 0x4b1   : > { %v1789_v57 = vpop.permute.xlu0 %1788  ;;  %v1909_v31 = vsel %vm1830_vm2, %v1787_v28, 0.0 }
 0x4b2   : > { %1850 = vadd.xlane.f32.xlu0 %v1849_v14  ;;  %1841 = vadd.xlane.f32.xlu1 %v1840_v5  ;;  %v1912_v10 = vsel %vm1830_vm2, %v1789_v57, 0.0  ;;  %v3284_v14 = vld [vmem:[#allocation9 + $0x38] sm:$0xff]  }
 0x4b3   : > { %3035 = vmatpush3.bf16.msra.mxu1 %v3282_v37 }
 0x4b4   : > { %v1791_v12 = vpop.permute.xlu1 %1790  ;;  %3036 = vmatprep.subr.bf16.mxu1 %v3283_v39 }
 0x4b5   : > { %v1793_v45 = vpop.permute.xlu0 %1792  ;;  %v1915_v30 = vsel %vm1830_vm2, %v1791_v12, 0.0 }
 0x4b6   : > { %1856 = vadd.xlane.f32.xlu0 %v1855_v40  ;;  %1853 = vadd.xlane.f32.xlu1 %v1852_v7  ;;  %v1918_v49 = vsel %vm1830_vm2, %v1793_v45, 0.0  ;;  %v3285_v7 = vld [vmem:[%s4706_s7] sm:$0xff]   ;;  %v3641_v40 = vmov 0.0  }
 0x4b7   : > { %3037 = vmatpush3.bf16.msra.mxu1 %v3284_v14  ;;  %3047 = vmatprep.subr.bf16.mxu0 %v3641_v40 }
 0x4b8   : > { %v1795_v35 = vpop.permute.xlu1 %1794  ;;  %3048 = vmatpush3.bf16.msra.mxu0 %v3285_v7  ;;  %3051 = vmatprep.mubr.msk.bf16.mxu0 %vm3642_vm3, %v3641_v40 }
 0x4b9   : > { %v1921_v52 = vsel %vm1830_vm2, %v1795_v35, 0.0  ;;  %v1797_v13 = vpop.permute.xlu0 %1796  ;;  %3049 = vmatprep.subr.bf16.mxu0 %v3641_v40 }
 0x4ba   : > { %1862 = vadd.xlane.f32.xlu0 %v1861_v33  ;;  %1859 = vadd.xlane.f32.xlu1 %v1858_v44  ;;  %v1924_v27 = vsel %vm1830_vm2, %v1797_v13, 0.0 }
 0x4bb   : > { %2447 = vmatmul.mubr.bf16.vlgmr.msra.gmra.mrb[0].mxu1 %v3994_v51 }
 0x4bc   : > { %3050 = vmatpush3.bf16.msra.mxu0 %v3286_v43 }
 0x4be   : > { %1868 = vadd.xlane.f32.xlu0 %v1867_v41  ;;  %1865 = vadd.xlane.f32.xlu1 %v1864_v1 }
 0x4c2   : > { %1874 = vadd.xlane.f32.xlu0 %v1873_v20  ;;  %1871 = vadd.xlane.f32.xlu1 %v1870_v58 }
 0x4c6   : > { %1880 = vadd.xlane.f32.xlu0 %v1879_v61  ;;  %1877 = vadd.xlane.f32.xlu1 %v1876_v22 }
 0x4ca   : > { %1886 = vadd.xlane.f32.xlu0 %v1885_v24  ;;  %1883 = vadd.xlane.f32.xlu1 %v1882_v63 }
 0x4ce   : > { %1892 = vadd.xlane.f32.xlu0 %v1891_v25  ;;  %1889 = vadd.xlane.f32.xlu1 %v1888_v21 }
 0x4d2   : > { %1898 = vadd.xlane.f32.xlu0 %v1897_v8  ;;  %1895 = vadd.xlane.f32.xlu1 %v1894_v23 }
 0x4d6   : > { %1904 = vadd.xlane.f32.xlu0 %v1903_v9  ;;  %1901 = vadd.xlane.f32.xlu1 %v1900_v46 }
 0x4da   : > { %1910 = vadd.xlane.f32.xlu0 %v1909_v31  ;;  %1907 = vadd.xlane.f32.xlu1 %v1906_v53  ;;  %v2523_v53 = vand.u32 127, %v906_v26 }
 0x4dc   : > { %v2528_v35 = vadd.s32 4294967288, %v2523_v53  ;;  %v4566_v26 = vsub.s32 %v2523_v53, %v3981_v29  ;;  %v2535_v59 = vadd.s32 4294967280, %v2523_v53  ;;  %v2542_v18 = vadd.s32 4294967272, %v2523_v53 }
 0x4de   : > { %1916 = vadd.xlane.f32.xlu0 %v1915_v30  ;;  %1913 = vadd.xlane.f32.xlu1 %v1912_v10 }
 0x4e2   : > { %1922 = vadd.xlane.f32.xlu0 %v1921_v52  ;;  %1919 = vadd.xlane.f32.xlu1 %v1918_v49 }
 0x4e6   : > { %1925 = vadd.xlane.f32.xlu1 %v1924_v27  ;;  %v4569_v27 = vsub.s32 %v2528_v35, %v3981_v29 }
 0x4f3   : > { %v2092_v4 = vpop.xlane.xlu0 %2091 }
 0x4f4   : > { %3355 = vrcp.f32 %v2092_v4 }
 0x4f7   : > { %v2101_v19 = vpop.xlane.xlu0 %2100  ;;  %v2089_v5 = vpop.xlane.xlu1 %2088 }
 0x4f8   : > { %3357 = vrcp.f32 %v2089_v5 }
 0x4f9   : > { %3359 = vrcp.f32 %v2101_v19 }
 0x4fb   : > { %v2095_v62 = vpop.xlane.xlu0 %2094  ;;  %v2104_v34 = vpop.xlane.xlu1 %2103 }
 0x4fc   : > { %3361 = vrcp.f32 %v2104_v34  ;;  %v4574_v34 = vsub.s32 %v2535_v59, %v3981_v29 }
 0x4fd   : > { %3363 = vrcp.f32 %v2095_v62 }
 0x4fe   : > { %v3356_v31 = vpop.eup %3355 }
 0x4ff   : > { %v2107_v44 = vpop.xlane.xlu0 %2106  ;;  %v2098_v33 = vpop.xlane.xlu1 %2097 }
 0x500   : > { %3365 = vrcp.f32 %v2098_v33 }
 0x501   : > { %3367 = vrcp.f32 %v2107_v44  ;;  %v4577_v44 = vsub.s32 %v2542_v18, %v3981_v29 }
 0x502   : > { %v3358_v15 = vpop.eup %3357 }
 0x503   : > { %v2113_v38 = vpop.xlane.xlu0 %2112  ;;  %v2110_v1 = vpop.xlane.xlu1 %2109 }
 0x504   : > { %3369 = vrcp.f32 %v2110_v1  ;;  %v3360_v0 = vpop.eup %3359 }
 0x505   : > { %3371 = vrcp.f32 %v2113_v38 }
 0x506   : > { %v3362_v49 = vpop.eup %3361 }
 0x507   : > { %v2119_v41 = vpop.xlane.xlu0 %2118  ;;  %v2116_v56 = vpop.xlane.xlu1 %2115 }
 0x508   : > { %3373 = vrcp.f32 %v2116_v56  ;;  %v3364_v47 = vpop.eup %3363 }
 0x509   : > { %3375 = vrcp.f32 %v2119_v41 }
 0x50a   : > { %v3366_v37 = vpop.eup %3365 }
 0x50b   : > { %v4524_v55 = vpop.xlane.xlu0 %2124  ;;  %v2122_v58 = vpop.xlane.xlu1 %2121 }
 0x50c   : > { %v3368_v5 = vpop.eup %3367  ;;  %3377 = vrcp.f32 %v2122_v58 }
 0x50d   : > { %3379 = vrcp.f32 %v4524_v55 }
 0x50e   : > { %v3370_v7 = vpop.eup %3369 }
 0x50f   : > { %v4526_v20 = vpop.xlane.xlu0 %2130  ;;  %v4528_v51 = vpop.xlane.xlu1 %2127 }
 0x510   : > { %3381 = vrcp.f32 %v4528_v51  ;;  %v3372_v53 = vpop.eup %3371 }
 0x511   : > { %3383 = vrcp.f32 %v4526_v20 }
 0x513   : > { %v4530_v60 = vpop.xlane.xlu0 %2136  ;;  %v4532_v22 = vpop.xlane.xlu1 %2133 }
 0x514   : > { %3385 = vrcp.f32 %v4532_v22 }
 0x515   : > { %3387 = vrcp.f32 %v4530_v60 }
 0x517   : > { %v4534_v61 = vpop.xlane.xlu0 %2142  ;;  %v4536_v54 = vpop.xlane.xlu1 %2139 }
 0x518   : > { %3389 = vrcp.f32 %v4536_v54 }
 0x519   : > { %3391 = vrcp.f32 %v4534_v61 }
 0x51b   : > { %v4538_v63 = vpop.xlane.xlu0 %2148  ;;  %v4540_v24 = vpop.xlane.xlu1 %2145 }
 0x51c   : > { %3393 = vrcp.f32 %v4540_v24 }
 0x51d   : > { %3395 = vrcp.f32 %v4538_v63 }
 0x51f   : > { %v4542_v48 = vpop.xlane.xlu0 %2154  ;;  %v4544_v2 = vpop.xlane.xlu1 %2151 }
 0x520   : > { %3397 = vrcp.f32 %v4544_v2 }
 0x521   : > { %3399 = vrcp.f32 %v4542_v48 }
 0x523   : > { %v4546_v21 = vpop.xlane.xlu0 %2160  ;;  %v4548_v25 = vpop.xlane.xlu1 %2157 }
 0x524   : > { %3401 = vrcp.f32 %v4548_v25 }
 0x525   : > { %3403 = vrcp.f32 %v4546_v21 }
 0x527   : > { %v4550_v6 = vpop.xlane.xlu0 %2166  ;;  %v4552_v23 = vpop.xlane.xlu1 %2163 }
 0x52b   : > { %v4554_v8 = vpop.xlane.xlu0 %2172  ;;  %v4556_v28 = vpop.xlane.xlu1 %2169 }
 0x52f   : > { %v4558_v46 = vpop.xlane.xlu0 %2178  ;;  %v4560_v9 = vpop.xlane.xlu1 %2175 }
 0x533   : > { %v1833_v57 = vpop.xlane.xlu0 %1832  ;;  %v4562_v12 = vpop.xlane.xlu1 %2181 }
 0x534   : > { %v2247_v10 = vmul.f32 %v3358_v15, %v1833_v57  ;;  %v3374_v15 = vpop.eup %3373  ;;  %3405 = vrcp.f32 %v4552_v23 }
 0x537   : > { %v1845_v16 = vpop.xlane.xlu0 %1844  ;;  %v1836_v45 = vpop.xlane.xlu1 %1835 }
 0x538   : > { %v2248_v30 = vmul.f32 %v3356_v31, %v1836_v45  ;;  %v2251_v17 = vmul.f32 %v3360_v0, %v1845_v16 }
 0x53a   : > { %v2454_v42 = vpack.c.bf16 %v2248_v30, %v2247_v10 }
 0x53b   : > { %v1839_v52 = vpop.xlane.xlu0 %1838  ;;  %v1848_v13 = vpop.xlane.xlu1 %1847 }
 0x53c   : > { %v2252_v32 = vmul.f32 %v3362_v49, %v1848_v13  ;;  %v2490_v36 = vunpack.c.l.b16 %v2454_v42  ;;  %v2491_v11 = vunpack.c.h.b16 %v2454_v42  ;;  %v2249_v39 = vmul.f32 %v3364_v47, %v1839_v52 }
 0x53e   : > { %v2456_v3 = vpack.c.bf16 %v2252_v32, %v2251_v17  ;;  %v2527_v14 = vrot.slane %v2490_v36, %v4566_v26  ;;  %v2532_v62 = vrot.slane %v2491_v11, %v4569_v27  ;;  %v3376_v36 = vpop.eup %3375  ;;  %3407 = vrcp.f32 %v4550_v6 }
 0x53f   : > { %v1851_v50 = vpop.xlane.xlu0 %1850  ;;  %v1842_v4 = vpop.xlane.xlu1 %1841 }
 0x540   : > { %v2250_v19 = vmul.f32 %v3366_v37, %v1842_v4  ;;  %v2494_v40 = vunpack.c.l.b16 %v2456_v3  ;;  %v2495_v43 = vunpack.c.h.b16 %v2456_v3  ;;  %v2253_v41 = vmul.f32 %v3368_v5, %v1851_v50  ;;  %v3378_v47 = vpop.eup %3377 }
 0x541   : > { %v2534_v31 = vsel %vm2533_vm4, %v2532_v62, %v2527_v14  ;;  %3409 = vrcp.f32 %v4556_v28 }
 0x542   : > { %v2455_v33 = vpack.c.bf16 %v2250_v19, %v2249_v39  ;;  %v2552_v16 = vrot.slane %v2494_v40, %v4566_v26  ;;  %v2556_v45 = vrot.slane %v2495_v43, %v4569_v27  ;;  %v3380_v19 = vpop.eup %3379  ;;  %3411 = vrcp.f32 %v4554_v8 }
 0x543   : > { %v1857_v38 = vpop.xlane.xlu0 %1856  ;;  %v1854_v1 = vpop.xlane.xlu1 %1853 }
 0x544   : > { %v2254_v56 = vmul.f32 %v3370_v7, %v1854_v1  ;;  %v2492_v58 = vunpack.c.l.b16 %v2455_v33  ;;  %v2493_v57 = vunpack.c.h.b16 %v2455_v33  ;;  %v2255_v35 = vmul.f32 %v3372_v53, %v1857_v38  ;;  %v3382_v14 = vpop.eup %3381 }
 0x545   : > { %v2557_v11 = vsel %vm2533_vm4, %v2556_v45, %v2552_v16  ;;  %v3384_v38 = vpop.eup %3383  ;;  %3413 = vrcp.f32 %v4560_v9 }
 0x546   : > { %v2457_v29 = vpack.c.bf16 %v2254_v56, %v2253_v41  ;;  %v2539_v55 = vrot.slane %v2492_v58, %v4574_v34  ;;  %v2546_v10 = vrot.slane %v2493_v57, %v4577_v44  ;;  %v3386_v58 = vpop.eup %3385  ;;  %3415 = vrcp.f32 %v4558_v46 }
 0x547   : > { %v1863_v51 = vpop.xlane.xlu0 %1862  ;;  %v1860_v30 = vpop.xlane.xlu1 %1859  ;;  %3417 = vrcp.f32 %v4562_v12 }
 0x548   : > { %v2496_v0 = vunpack.c.l.b16 %v2457_v29  ;;  %v2497_v42 = vunpack.c.h.b16 %v2457_v29  ;;  %v2256_v49 = vmul.f32 %v3374_v15, %v1860_v30  ;;  %v2541_v20 = vsel %vm2540_vm5, %v2539_v55, %v2534_v31  ;;  %v3388_v63 = vpop.eup %3387 }
 0x549   : > { %v2548_v52 = vsel %vm2547_vm6, %v2546_v10, %v2541_v20  ;;  %v2257_v37 = vmul.f32 %v3376_v36, %v1863_v51  ;;  %v3390_v20 = vpop.eup %3389 }
 0x54a   : > { %v2561_v13 = vrot.slane %v2496_v0, %v4574_v34  ;;  %v2566_v17 = vrot.slane %v2497_v42, %v4577_v44  ;;  %v2458_v32 = vpack.c.bf16 %v2256_v49, %v2255_v35 }
 0x54b   : > { %v1869_v3 = vpop.xlane.xlu0 %1868  ;;  %v1866_v59 = vpop.xlane.xlu1 %1865 }
 0x54c   : > { %v2562_v50 = vsel %vm2540_vm5, %v2561_v13, %v2557_v11  ;;  %v2498_v18 = vunpack.c.l.b16 %v2458_v32  ;;  %v2499_v22 = vunpack.c.h.b16 %v2458_v32  ;;  %v2258_v39 = vmul.f32 %v3378_v47, %v1866_v59  ;;  %v3392_v32 = vpop.eup %3391 }
 0x54d   : > { %v2567_v4 = vsel %vm2547_vm6, %v2566_v17, %v2562_v50  ;;  %v2259_v60 = vmul.f32 %v3380_v19, %v1869_v3  ;;  %v3394_v3 = vpop.eup %3393 }
 0x54e   : > { %v2683_v5 = vsel %vm2682_vm7, %v2567_v4, %v2548_v52  ;;  %v2571_v62 = vrot.slane %v2498_v18, %v4566_v26  ;;  %v2575_v7 = vrot.slane %v2499_v22, %v4569_v27  ;;  %v2459_v40 = vpack.c.bf16 %v2258_v39, %v2257_v37  ;;  %v3396_v37 = vpop.eup %3395 }
 0x54f   : > { %v1875_v43 = vpop.xlane.xlu0 %1874  ;;  %v1872_v33 = vpop.xlane.xlu1 %1871 }
 0x550   : > { %v2260_v1 = vmul.f32 %v3382_v14, %v1872_v33  ;;  %v2500_v41 = vunpack.c.l.b16 %v2459_v40  ;;  %v2501_v56 = vunpack.c.h.b16 %v2459_v40  ;;  %v2576_v57 = vsel %vm2533_vm4, %v2575_v7, %v2571_v62  ;;  %v3398_v62 = vpop.eup %3397 }
 0x551   : > { %v2261_v61 = vmul.f32 %v3384_v38, %v1875_v43 }
 0x552   : > { %v2460_v54 = vpack.c.bf16 %v2260_v1, %v2259_v60  ;;  %v2580_v53 = vrot.slane %v2500_v41, %v4574_v34  ;;  %v2585_v31 = vrot.slane %v2501_v56, %v4577_v44 }
 0x553   : > { %v1881_v29 = vpop.xlane.xlu0 %1880  ;;  %v1878_v15 = vpop.xlane.xlu1 %1877 }
 0x554   : > { %v2502_v16 = vunpack.c.l.b16 %v2460_v54  ;;  %v2503_v45 = vunpack.c.h.b16 %v2460_v54  ;;  %v2262_v55 = vmul.f32 %v3386_v58, %v1878_v15  ;;  %v2581_v24 = vsel %vm2540_vm5, %v2580_v53, %v2576_v57  ;;  %v3400_v54 = vpop.eup %3399 }
 0x555   : > { %v2586_v10 = vsel %vm2547_vm6, %v2585_v31, %v2581_v24  ;;  %v2263_v2 = vmul.f32 %v3388_v63, %v1881_v29  ;;  %v3402_v53 = vpop.eup %3401 }
 0x556   : > { %v2461_v51 = vpack.c.bf16 %v2262_v55, %v2261_v61  ;;  %v2685_v30 = vsel %vm2684_vm8, %v2586_v10, %v2683_v5  ;;  %v2590_v35 = vrot.slane %v2502_v16, %v4566_v26  ;;  %v2594_v0 = vrot.slane %v2503_v45, %v4569_v27  ;;  %v3404_v45 = vpop.eup %3403 }
 0x557   : > { %v1887_v42 = vpop.xlane.xlu0 %1886  ;;  %v1884_v49 = vpop.xlane.xlu1 %1883 }
 0x558   : > { %v2504_v52 = vunpack.c.l.b16 %v2461_v51  ;;  %v2505_v13 = vunpack.c.h.b16 %v2461_v51  ;;  %v2264_v17 = vmul.f32 %v3390_v20, %v1884_v49  ;;  %v2595_v59 = vsel %vm2533_vm4, %v2594_v0, %v2590_v35  ;;  %v3406_v24 = vpop.eup %3405 }
 0x559   : > { %v2265_v22 = vmul.f32 %v3392_v32, %v1887_v42  ;;  %v3408_v42 = vpop.eup %3407 }
 0x55a   : > { %v2599_v36 = vrot.slane %v2504_v52, %v4574_v34  ;;  %v2604_v11 = vrot.slane %v2505_v13, %v4577_v44  ;;  %v2462_v47 = vpack.c.bf16 %v2264_v17, %v2263_v2  ;;  %v3410_v9 = vpop.eup %3409 }
 0x55b   : > { %v1893_v50 = vpop.xlane.xlu0 %1892  ;;  %v1890_v18 = vpop.xlane.xlu1 %1889 }
 0x55c   : > { %v2600_v48 = vsel %vm2540_vm5, %v2599_v36, %v2595_v59  ;;  %v2266_v4 = vmul.f32 %v3394_v3, %v1890_v18  ;;  %v2506_v39 = vunpack.c.l.b16 %v2462_v47  ;;  %v2507_v19 = vunpack.c.h.b16 %v2462_v47  ;;  %v3412_v18 = vpop.eup %3411 }
 0x55d   : > { %v2605_v25 = vsel %vm2547_vm6, %v2604_v11, %v2600_v48  ;;  %v2267_v33 = vmul.f32 %v3396_v37, %v1893_v50 }
 0x55e   : > { %v2687_v5 = vsel %vm2686_vm9, %v2605_v25, %v2685_v30  ;;  %v2463_v14 = vpack.c.bf16 %v2266_v4, %v2265_v22  ;;  %v2609_v7 = vrot.slane %v2506_v39, %v4566_v26  ;;  %v2613_v21 = vrot.slane %v2507_v19, %v4569_v27  ;;  %v3414_v4 = vpop.eup %3413 }
 0x55f   : > { %v1899_v40 = vpop.xlane.xlu0 %1898  ;;  %v1896_v43 = vpop.xlane.xlu1 %1895 }
 0x560   : > { %v2508_v38 = vunpack.c.l.b16 %v2463_v14  ;;  %v2509_v60 = vunpack.c.h.b16 %v2463_v14  ;;  %v2268_v1 = vmul.f32 %v3398_v62, %v1896_v43  ;;  %v2614_v6 = vsel %vm2533_vm4, %v2613_v21, %v2609_v7  ;;  %v3416_v25 = vpop.eup %3415 }
 0x561   : > { %v2269_v61 = vmul.f32 %v3400_v54, %v1899_v40  ;;  %v3418_v21 = vpop.eup %3417 }
 0x562   : > { %v2618_v23 = vrot.slane %v2508_v38, %v4574_v34  ;;  %v2623_v41 = vrot.slane %v2509_v60, %v4577_v44  ;;  %v2464_v56 = vpack.c.bf16 %v2268_v1, %v2267_v33 }
 0x563   : > { %v1905_v58 = vpop.xlane.xlu0 %1904  ;;  %v1902_v57 = vpop.xlane.xlu1 %1901 }
 0x564   : > { %v2619_v31 = vsel %vm2540_vm5, %v2618_v23, %v2614_v6  ;;  %v2510_v29 = vunpack.c.l.b16 %v2464_v56  ;;  %v2511_v15 = vunpack.c.h.b16 %v2464_v56  ;;  %v2270_v16 = vmul.f32 %v3402_v53, %v1902_v57 }
 0x565   : > { %v2624_v28 = vsel %vm2547_vm6, %v2623_v41, %v2619_v31  ;;  %v2271_v0 = vmul.f32 %v3404_v45, %v1905_v58 }
 0x566   : > { %v2689_v55 = vsel %vm2688_vm10, %v2624_v28, %v2687_v5  ;;  %v2465_v10 = vpack.c.bf16 %v2270_v16, %v2269_v61  ;;  %v2628_v30 = vrot.slane %v2510_v29, %v4566_v26  ;;  %v2632_v35 = vrot.slane %v2511_v15, %v4569_v27 }
 0x567   : > { %v1911_v51 = vpop.xlane.xlu0 %1910  ;;  %v1908_v63 = vpop.xlane.xlu1 %1907 }
 0x568   : > { %v2272_v8 = vmul.f32 %v3406_v24, %v1908_v63  ;;  %v2512_v49 = vunpack.c.l.b16 %v2465_v10  ;;  %v2513_v20 = vunpack.c.h.b16 %v2465_v10  ;;  %v2633_v32 = vsel %vm2533_vm4, %v2632_v35, %v2628_v30 }
 0x569   : > { %v2273_v36 = vmul.f32 %v3408_v42, %v1911_v51 }
 0x56a   : > { %v2466_v52 = vpack.c.bf16 %v2272_v8, %v2271_v0  ;;  %v2637_v13 = vrot.slane %v2512_v49, %v4574_v34  ;;  %v2642_v46 = vrot.slane %v2513_v20, %v4577_v44 }
 0x56b   : > { %v1917_v2 = vpop.xlane.xlu0 %1916  ;;  %v1914_v17 = vpop.xlane.xlu1 %1913 }
 0x56c   : > { %v2274_v11 = vmul.f32 %v3410_v9, %v1914_v17  ;;  %v2638_v3 = vsel %vm2540_vm5, %v2637_v13, %v2633_v32  ;;  %v2514_v12 = vunpack.c.l.b16 %v2466_v52  ;;  %v2515_v47 = vunpack.c.h.b16 %v2466_v52 }
 0x56d   : > { %v2643_v59 = vsel %vm2547_vm6, %v2642_v46, %v2638_v3  ;;  %v2275_v39 = vmul.f32 %v3412_v18, %v1917_v2 }
 0x56e   : > { %v2467_v50 = vpack.c.bf16 %v2274_v11, %v2273_v36  ;;  %v2691_v48 = vsel %vm2690_vm11, %v2643_v59, %v2689_v55  ;;  %v2647_v14 = vrot.slane %v2514_v12, %v4566_v26  ;;  %v2651_v62 = vrot.slane %v2515_v47, %v4569_v27 }
 0x56f   : > { %v1920_v22 = vpop.xlane.xlu1 %1919  ;;  %v1923_v19 = vpop.xlane.xlu0 %1922 }
 0x570   : > { %v2516_v37 = vunpack.c.l.b16 %v2467_v50  ;;  %v2276_v5 = vmul.f32 %v3414_v4, %v1920_v22  ;;  %v2517_v7 = vunpack.c.h.b16 %v2467_v50  ;;  %v2277_v38 = vmul.f32 %v3416_v25, %v1923_v19 }
 0x571   : > { %v2652_v41 = vsel %vm2533_vm4, %v2651_v62, %v2647_v14 }
 0x572   : > { %v2656_v40 = vrot.slane %v2516_v37, %v4574_v34  ;;  %v2468_v43 = vpack.c.bf16 %v2276_v5, %v2275_v39  ;;  %v2661_v56 = vrot.slane %v2517_v7, %v4577_v44 }
 0x573   : > { %v1926_v33 = vpop.xlane.xlu1 %1925 }
 0x574   : > { %v2278_v60 = vmul.f32 %v3418_v21, %v1926_v33  ;;  %v2518_v1 = vunpack.c.l.b16 %v2468_v43  ;;  %v2519_v23 = vunpack.c.h.b16 %v2468_v43  ;;  %v2657_v6 = vsel %vm2540_vm5, %v2656_v40, %v2652_v41 }
 0x575   : > { %v2662_v29 = vsel %vm2547_vm6, %v2661_v56, %v2657_v6 }
 0x576   : > { %v2469_v54 = vpack.c.bf16 %v2278_v60, %v2277_v38  ;;  %v2666_v58 = vrot.slane %v2518_v1, %v4566_v26  ;;  %v2670_v57 = vrot.slane %v2519_v23, %v4569_v27  ;;  %v2693_v45 = vsel %vm2692_vm12, %v2662_v29, %v2691_v48 }
 0x578   : > { %v2520_v53 = vunpack.c.l.b16 %v2469_v54  ;;  %v2521_v31 = vunpack.c.h.b16 %v2469_v54  ;;  %v2671_v61 = vsel %vm2533_vm4, %v2670_v57, %v2666_v58 }
 0x57a   : > { %v2675_v15 = vrot.slane %v2520_v53, %v4574_v34  ;;  %v2680_v28 = vrot.slane %v2521_v31, %v4577_v44  ;;  %v2973_v34 = vld [vmem:[%s4705_s6] ss:$0 sm:$0xff] }
 0x57c   : > { %v2676_v16 = vsel %vm2540_vm5, %v2675_v15, %v2671_v61 }
 0x57d   : > { %v2681_v55 = vsel %vm2547_vm6, %v2680_v28, %v2676_v16 }
 0x57e   : > { %v2695_v26 = vsel %vm2694_vm13, %v2681_v55, %v2693_v45 }
 0x57f   : > { %v2696_v24 = vpack.c.b16 %v2695_v26, %v2695_v26 }
 0x581   : > { %3052 = vmatmul.mubr.msk.bf16.vlgmr.msra.gmra.mrb[4].mxu0 %vm1830_vm2, %v2696_v24 }
 0x58e   : > { %v3038_v27 = vpop.f32.mrb[0].mxu1 }
 0x58f   : > { %v3039_v10 = vpop.f32.mrb[1].mxu1 }
 0x590   : > { %v3040_v51 = vadd.f32 %v3039_v10, %v3038_v27  ;;  %v3041_v63 = vpop.f32.mrb[2].mxu1 }
 0x591   : > { %v3042_v30 = vpop.f32.mrb[3].mxu1 }
 0x592   : > { %v2449_v44 = vadd.f32 %v3040_v51, %v2973_v34 }
 0x654   : > { %v2746_v35 = vpop.f32.mrb[4].mxu0 }
 0x655   : > { %v2752_v0 = vadd.f32 %v2746_v35, %v2449_v44  ;;  %v3053_v8 = vpop.f32.mrb[5].mxu0 }
 0x656   : > { %v2749_v42 = vpop.f32.mrb[6].mxu0 }
 0x657   : > { %2753 = vst [vmem:[#allocation11] sm:$0xff] %v2752_v0  ;;  %v3054_v49 = vpop.f32.mrb[7].mxu0 }
 0x658 PF: > { %p3090_p2 = scmp.eq.s32.totalorder %s3718_s11, 3  ;;  %s3643_s15 = smov [#allocation11]  }
 0x659   : > { %s2763_s19 = sshll.u32 %s3643_s15, 4  ;;  %s2764_s19 = int_to_ptr.vmem [resolvable:$true] %s2763_s19 }
 0x65a   : > { %s3535_s22 = scalar_lea.vmem %s2764_s19, 128  ;;  %p3542_p8 = scmp.lt.s32.totalorder %s2764_s19, %s2764_s19 }
 0x65b   : > { %p3536_p3 = scmp.ne.s32.totalorder %s2764_s19, %s3535_s22  ;;  %p3543_p1 = scmp.lt.s32.totalorder %s3535_s22, %s3535_s22 }
 0x65d   : > { %p3537_p0 = pnand %p3536_p3, %p3090_p2  ;;  %p3544_p12 = por %p3543_p1, %p3542_p8 }
 0x65f   : > { %p3538_p6 = pneg %p3537_p0 }
 0x661   : > { %p3545_p9 = pnand %p3544_p12, %p3538_p6 }
 0x663   : > { %3548 = shalt.err (!%p3545_p9)
}
 0x664   : > { %s3549_s24 = scalar_lea.hbm %s4707_s8, 128 }
 0x665   : > { %p3550_p7 = scmp.ne.s32.totalorder %s4707_s8, %s3549_s24  ;;  %p3555_p10 = scmp.lt.u32.totalorder %s3549_s24, %s4707_s8 }
 0x667   : > { %p3551_p4 = pnand %p3550_p7, %p3090_p2 }
 0x669   : > { %p3552_p5 = pneg %p3551_p4 }
 0x66b   : > { %p3557_p11 = pnand %p3555_p10, %p3552_p5 }
 0x66d   : > { %3560 = shalt.err (!%p3557_p11)
}
 0x66e   : > { %3068 = dma.vmem_to_hbm [thread:$0]  (%p3090_p2), %s2764_s19, 128, %s4707_s8, [#allocation5]  }
 0x66f   : > { %3602 = dma.done.wait (%p3090_p2), [#allocation5], 128  }
 0x670   : > { %3604 = vsyncadd (%p3090_p2), [#allocation5], 4294967168 }
 0x671 PF: > { %s26_s10 = sadd.s32 1, %s3627_s10   ;;  %s4728_s27 = smov %s3611_s28 }
 0x672   : > { %p23_p13 = scmp.ge.s32.totalorder %s26_s10, 6   ;;  %s4729_s28 = smov %s3615_s29 }
 0x673   : > { %s4730_s29 = smov %s3807_s14  ;;  %s4731_s30 = smov %s3623_s9 }
 0x674   : > { %s4732_s9 = smov %s4734_s20  ;;  %25 = sbr.rel (!%p23_p13) target bundleno = 12 (0xc), region = 119 }
 0x67b   :  { %2776 = vsyncpa [#allocation4], 1 }
 0x67c   :  { %2778 = vsyncpa [#allocation4 + $0x1], 1 }
 0x67d   :  { %2779 = vsyncpa [#allocation7], 1 }
 0x67e   :  { %2781 = vsyncpa [#allocation7 + $0x1], 1 }
 0x67f   :  { %2782 = vsyncpa [#allocation10], 1 }
 0x680   :  { %2783 = vsyncpa [#allocation5], 1 }
 0x681   :  { %2785 = vsyncpa [#allocation5 + $0x1], 1 }

</bundles_post_ra>
